<compile_context>
chip_gen: v7x
topology: tpu7x:2x2x1
jax: 0.10.0
libtpu: 0.0.40
codegen_flags: <defaults>
</compile_context>

<pallas_src>
import functools
import numpy as np

import jax
import jax.numpy as jnp
from jax.experimental import pallas as pl
from jax.experimental.pallas import tpu as pltpu  # noqa: F401  (TPU backend assumed)

# ----------------------------- config (small, synthetic) --------------------
VOCAB = 128
NUM_LAYERS = 2
D_MODEL = 32              # config.embedding_dim
NUM_HEADS = 4
HEAD_DIM = D_MODEL // NUM_HEADS
FF_DIM = 64
NUM_BUCKETS = 8           # relative attention buckets
EPS = 1e-6                # T5 RMSNorm eps
BATCH = 2
SEQ = 8

D_PAD = 128               # lane-dense padded model dim (residual stream)
FF_PAD = 128              # lane-dense padded FF dim
QKV_PAD = 128             # packed QKV output width: 3*H*hd = 96 -> 128


# ----------------------------- Pallas kernel ---------------------------------
def _t5_stack_kernel(x_ref, bias_ref, anw_ref, fnw_ref, finw_ref,
                     wqkv_ref, wo_ref, wi_ref, woff_ref, out_ref,
                     *, num_layers, num_heads, head_dim, batch, seq,
                     d_true, eps):
  """Entire T5 encoder stack (all layers + final norm), fully VMEM-resident."""
  B, T, H, hd = batch, seq, num_heads, head_dim
  BT = B * T
  Dp = x_ref.shape[-1]
  bf16 = jnp.bfloat16

  x = x_ref[...].reshape(BT, Dp)          # residual stream, f32, pad lanes == 0
  bias = bias_ref[...]                    # (H*B, T, T) additive (mask + rel bias)

  inv_d = 1.0 / d_true

  def rms(v, w):                          # T5 RMSNorm (no mean subtraction).
    # Padded lanes of v are kept exactly zero by every residual write (zero
    # output columns of wo / wo_ff), so sum over Dp == sum over true D.
    var = jnp.sum(v * v, axis=-1, keepdims=True) * inv_d
    return v * jax.lax.rsqrt(var + eps) * w

  for l in range(num_layers):             # static unroll (NUM_LAYERS is tiny)
    # ---------------- self-attention ----------------
    h = rms(x, anw_ref[l]).astype(bf16)                       # (BT, Dp)

    # Single full-width QKV matmul: one MXU weight load, lane-dense output.
    qkv = jnp.dot(h, wqkv_ref[l],
                  preferred_element_type=jnp.float32)         # (BT, QKV_PAD) f32

    def heads_leading(base):
      # Lanes -> leading head axis: static lane slices + stack, then the
      # (proven) leading-axis reshape to (H*B, T, hd).  Done in f32 (simpler
      # layout), cast to bf16 at the end for the MXU.
      g = jnp.stack(
          [qkv[:, (base + i) * hd:(base + i + 1) * hd] for i in range(H)],
          axis=0)                                             # (H, BT, hd)
      return g.reshape(H * B, T, hd).astype(bf16)

    qg = heads_leading(0)          # Q heads
    kg = heads_leading(H)          # K heads
    vg = heads_leading(2 * H)      # V heads

    # T5 attention: scores are NOT scaled by 1/sqrt(head_dim).
    s = jnp.einsum('gqd,gkd->gqk', qg, kg,
                   preferred_element_type=jnp.float32)        # (H*B, T, T)
    s = s + bias
    s = s - jnp.max(s, axis=-1, keepdims=True)
    p = jnp.exp(s)
    p = p * pl.reciprocal(jnp.sum(p, axis=-1, keepdims=True), approx=True)

    ctx = jnp.einsum('gqk,gkd->gqd', p.astype(bf16), vg,
                     preferred_element_type=jnp.float32)      # (H*B, T, hd) f32
    # Heads -> lanes (head-major), then ONE output-projection matmul whose
    # K = H*hd contraction also performs the head-sum.
    ctxh = ctx.reshape(H, BT, hd)                             # leading split
    ctx2 = jnp.concatenate([ctxh[i] for i in range(H)], axis=-1)  # (BT, H*hd)
    x = x + jnp.dot(ctx2.astype(bf16), wo_ref[l],
                    preferred_element_type=jnp.float32)       # (BT, Dp)

    # ---------------- feed-forward (ReLU, non-gated) ----------------
    h2 = rms(x, fnw_ref[l]).astype(bf16)
    a = jnp.dot(h2, wi_ref[l], preferred_element_type=jnp.float32)   # (BT, Fp)
    a = jnp.maximum(a, 0.0).astype(bf16)
    x = x + jnp.dot(a, woff_ref[l], preferred_element_type=jnp.float32)

  x = rms(x, finw_ref[...])               # final RMSNorm, fused into same call
  out_ref[...] = x.reshape(B, T, Dp)


# ----------------------------- host-side packing ------------------------------
def _pack_params(params):
  """Pad to lane-dense widths, pack QKV/wo for single-matmul use, cast bf16."""
  D, Dp, F, Fp = D_MODEL, D_PAD, FF_DIM, FF_PAD

  def pad_last(a, new):
    return jnp.pad(a, [(0, 0)] * (a.ndim - 1) + [(0, new - a.shape[-1])])

  wqkv, wo, wi, woff, anw, fnw = [], [], [], [], [], []
  for p in params["layers"]:
    # Packed QKV: columns [wq | wk | wv | 0-pad].  Original column order is
    # already head-major (head = col // hd), matching the kernel's lane split.
    w3 = jnp.concatenate([p["wq"], p["wk"], p["wv"]], axis=1)       # (D, 3D)
    wqkv.append(jnp.pad(w3, ((0, Dp - D), (0, QKV_PAD - 3 * D))))   # (Dp, QKVp)
    # Output projection: rows are head-major (as in the reference flatten);
    # only the output columns are padded -> zero pad lanes in the residual.
    wo.append(pad_last(p["wo"], Dp))                                # (H*hd, Dp)
    wi.append(jnp.pad(p["wi"], ((0, Dp - D), (0, Fp - F))))         # (Dp, Fp)
    woff.append(jnp.pad(p["wo_ff"], ((0, Fp - F), (0, Dp - D))))    # (Fp, Dp)
    anw.append(pad_last(p["attn_norm_w"], Dp))                      # (1, Dp)
    fnw.append(pad_last(p["ff_norm_w"], Dp))

  bf = lambda xs: jnp.stack(xs).astype(jnp.bfloat16)
  f32 = lambda xs: jnp.stack(xs).astype(jnp.float32)
  return {
      "emb_pad": pad_last(params["emb"], Dp),                       # (VOCAB, Dp)
      "rel_bias": params["rel_bias"],                               # (BUCKETS, H)
      "wqkv": bf(wqkv),          # (L, Dp, QKV_PAD)
      "wo": bf(wo),              # (L, H*hd, Dp)
      "wi": bf(wi),              # (L, Dp, Fp)
      "wo_ff": bf(woff),         # (L, Fp, Dp)
      "attn_norm_w": f32(anw),   # (L, 1, Dp)
      "ff_norm_w": f32(fnw),     # (L, 1, Dp)
      "final_norm_w": pad_last(params["final_norm_w"].reshape(1, D_MODEL), Dp),
  }


def t5_stack_forward(input_ids, input_pos, attention_mask, relative_position,
                     kparams):
  """T5Stack.forward (encoder path). input_pos is unused on this path."""
  del input_pos  # TODO(synk): decoder path (is_decoder=True: KV cache / cross-attention) not exercised here.
  B, T = input_ids.shape
  H = NUM_HEADS

  # Embedding lookup (gather) — plain-JAX glue; padded lanes are zero.
  hidden = kparams["emb_pad"][input_ids].astype(jnp.float32)        # (B, T, Dp)

  # Relative-position bias comes from layer 0's relative_attention_bias and is
  # shared by every subsequent layer (as in T5Stack). Pre-add the attention
  # mask once here and reorder to the kernel's (head*batch, T, T) batch order.
  pos_bias = kparams["rel_bias"][relative_position]                 # (1,T,T,H)
  pos_bias = jnp.transpose(pos_bias, (0, 3, 1, 2)).astype(jnp.float32)
  combined = jnp.broadcast_to(attention_mask + pos_bias, (B, H, T, T))
  bias_g = jnp.transpose(combined, (1, 0, 2, 3)).reshape(H * B, T, T)

  kernel = functools.partial(
      _t5_stack_kernel, num_layers=NUM_LAYERS, num_heads=H, head_dim=HEAD_DIM,
      batch=B, seq=T, d_true=D_MODEL, eps=EPS)

  # Single grid-less pallas_call: every input/output is one whole-array VMEM
  # block (total footprint ~0.3 MB — fits v5e/v6e/v7x VMEM with huge margin).
  # At real T5 dims: add a layer/batch grid ("parallel" for v7x's 2nd TC,
  # per-layer weight BlockSpecs to stream weights) — pointless at 2x8 toy size.
  out = pl.pallas_call(
      kernel,
      out_shape=jax.ShapeDtypeStruct((B, T, D_PAD), jnp.float32),
  )(hidden, bias_g, kparams["attn_norm_w"], kparams["ff_norm_w"],
    kparams["final_norm_w"], kparams["wqkv"], kparams["wo"], kparams["wi"],
    kparams["wo_ff"])

  return out[..., :D_MODEL]            # drop lane padding


# ----------------------------- pure-JAX reference ----------------------------
def _ref_forward(input_ids, attention_mask, relative_position, params):
  x = params["emb"][input_ids].astype(jnp.float32)
  pos_bias = jnp.transpose(params["rel_bias"][relative_position], (0, 3, 1, 2))

  def rms(v, w):
    return v * jax.lax.rsqrt(jnp.mean(v * v, -1, keepdims=True) + EPS) * w

  B, T, D = x.shape
  for p in params["layers"]:
    h = rms(x, p["attn_norm_w"][0])
    q, k, v = h @ p["wq"], h @ p["wk"], h @ p["wv"]
    sp = lambda a: a.reshape(B, T, NUM_HEADS, HEAD_DIM).transpose(0, 2, 1, 3)
    q, k, v = sp(q), sp(k), sp(v)
    s = jnp.einsum("bhqd,bhkd->bhqk", q, k) + attention_mask + pos_bias
    pr = jax.nn.softmax(s, axis=-1)
    ctx = jnp.einsum("bhqk,bhkd->bhqd", pr, v).transpose(0, 2, 1, 3)
    x = x + ctx.reshape(B, T, D) @ p["wo"]
    h2 = rms(x, p["ff_norm_w"][0])
    x = x + jnp.maximum(h2 @ p["wi"], 0.0) @ p["wo_ff"]
  return rms(x, params["final_norm_w"][0, 0])


# ----------------------------- params & main ---------------------------------
def _init_params(key):
  ks = iter(jax.random.split(key, 2 + NUM_LAYERS * 8))
  nrm = lambda s: (0.05 * jax.random.normal(next(ks), s)).astype(jnp.float32)
  params = {
      "emb": nrm((VOCAB, D_MODEL)),
      "rel_bias": nrm((NUM_BUCKETS, NUM_HEADS)),
      "layers": [],
  }
  for _ in range(NUM_LAYERS):
    params["layers"].append({
        # Linear weights stored pre-transposed to (in, out): y = x @ W.
        "wq": nrm((D_MODEL, D_MODEL)), "wk": nrm((D_MODEL, D_MODEL)),
        "wv": nrm((D_MODEL, D_MODEL)), "wo": nrm((D_MODEL, D_MODEL)),
        "wi": nrm((D_MODEL, FF_DIM)), "wo_ff": nrm((FF_DIM, D_MODEL)),
        "attn_norm_w": 1.0 + nrm((1, D_MODEL)),
        "ff_norm_w": 1.0 + nrm((1, D_MODEL)),
    })
  params["final_norm_w"] = (1.0 + 0.05 * jax.random.normal(
      jax.random.PRNGKey(1234), (1, 1, D_MODEL))).astype(jnp.float32)
  return params


if __name__ == "__main__":
  key = jax.random.PRNGKey(0)
  kparam, kid = jax.random.split(key)
  params = _init_params(kparam)
  packed = _pack_params(params)

  # Guard the RMSNorm invariant: weight pad columns that feed the residual
  # stream must be exactly zero (correctness concern from the review).
  assert float(jnp.abs(packed["wo"][:, :, D_MODEL:]).max()) == 0.0
  assert float(jnp.abs(packed["wo_ff"][:, :, D_MODEL:]).max()) == 0.0
  assert float(jnp.abs(packed["emb_pad"][:, D_MODEL:]).max()) == 0.0

  # Inputs of T5Stack.forward (encoder-style).
  input_ids = jax.random.randint(kid, (BATCH, SEQ), 0, VOCAB, dtype=jnp.int32)
  input_pos = jnp.arange(SEQ, dtype=jnp.int32)
  attention_mask = jnp.zeros((BATCH, 1, SEQ, SEQ), dtype=jnp.float32)  # all-visible

  # Deterministic relative-position bucket indices (an *input* to the module).
  q_pos = np.arange(SEQ)[:, None]
  k_pos = np.arange(SEQ)[None, :]
  rel = k_pos - q_pos
  half = NUM_BUCKETS // 2
  buckets = np.where(rel > 0,
                     np.minimum(rel, half - 1) + half,
                     np.minimum(-rel, half - 1)).astype(np.int32)
  relative_position = jnp.asarray(buckets[None])                      # (1,T,T)

  out = t5_stack_forward(input_ids, input_pos, attention_mask,
                         relative_position, packed)
  out = jax.block_until_ready(out)

  ref = _ref_forward(input_ids, attention_mask, relative_position, params)
  assert out.shape == (BATCH, SEQ, D_MODEL) and out.dtype == jnp.float32
  # Tolerance accounts for bf16 MXU operands + approx softmax reciprocal in the
  # kernel vs. the exact-f32 reference (structure verified exactly in the
  # earlier all-f32 version).
  np.testing.assert_allclose(np.asarray(out), np.asarray(ref),
                             rtol=3e-2, atol=3e-2)
  print("KERNEL_OK")
</pallas_src>

<mosaic_0001>
module attributes {stable_mosaic.version = 11 : i64} {
  func.func @_t5_stack_kernel(%arg0: memref<2x8x128xf32, #tpu.memory_space<vmem>>, %arg1: memref<8x8x8xf32, #tpu.memory_space<vmem>>, %arg2: memref<2x1x128xf32, #tpu.memory_space<vmem>>, %arg3: memref<2x1x128xf32, #tpu.memory_space<vmem>>, %arg4: memref<1x128xf32, #tpu.memory_space<vmem>>, %arg5: memref<2x128x128xbf16, #tpu.memory_space<vmem>>, %arg6: memref<2x32x128xbf16, #tpu.memory_space<vmem>>, %arg7: memref<2x128x128xbf16, #tpu.memory_space<vmem>>, %arg8: memref<2x128x128xbf16, #tpu.memory_space<vmem>>, %arg9: memref<2x8x128xf32, #tpu.memory_space<vmem>>) attributes {dimension_semantics = [], scalar_prefetch = 0 : i64, scratch_operands = 0 : i64, tpu.core_type = #tpu.core_type<tc>} {
    %c0 = arith.constant 0 : index
    %c0_0 = arith.constant 0 : index
    %c0_1 = arith.constant 0 : index
    %0 = vector.load %arg0[%c0, %c0_0, %c0_1] : memref<2x8x128xf32, #tpu.memory_space<vmem>>, vector<2x8x128xf32>
    %1 = vector.shape_cast %0 : vector<2x8x128xf32> to vector<16x128xf32>
    %c0_2 = arith.constant 0 : index
    %c0_3 = arith.constant 0 : index
    %c0_4 = arith.constant 0 : index
    %2 = vector.load %arg1[%c0_2, %c0_3, %c0_4] : memref<8x8x8xf32, #tpu.memory_space<vmem>>, vector<8x8x8xf32>
    %c0_5 = arith.constant 0 : index
    %c0_6 = arith.constant 0 : index
    %c0_7 = arith.constant 0 : index
    %3 = vector.load %arg2[%c0_5, %c0_6, %c0_7] : memref<2x1x128xf32, #tpu.memory_space<vmem>>, vector<1x1x128xf32>
    %4 = vector.shape_cast %3 : vector<1x1x128xf32> to vector<1x128xf32>
    %5 = arith.mulf %1, %1 : vector<16x128xf32>
    %cst = arith.constant dense<0.000000e+00> : vector<16xf32>
    %6 = vector.multi_reduction <add>, %5, %cst [1] : vector<16x128xf32> to vector<16xf32>
    %7 = vector.shape_cast %6 : vector<16xf32> to vector<16x1xf32>
    %cst_8 = arith.constant 3.125000e-02 : f32
    %8 = vector.broadcast %cst_8 : f32 to vector<16x1xf32>
    %9 = arith.mulf %7, %8 : vector<16x1xf32>
    %cst_9 = arith.constant 9.99999997E-7 : f32
    %10 = vector.broadcast %cst_9 : f32 to vector<16x1xf32>
    %11 = arith.addf %9, %10 : vector<16x1xf32>
    %12 = math.rsqrt %11 : vector<16x1xf32>
    %13 = vector.broadcast %12 : vector<16x1xf32> to vector<16x128xf32>
    %14 = arith.mulf %1, %13 : vector<16x128xf32>
    %15 = vector.broadcast %4 : vector<1x128xf32> to vector<16x128xf32>
    %16 = arith.mulf %14, %15 : vector<16x128xf32>
    %17 = arith.truncf %16 : vector<16x128xf32> to vector<16x128xbf16>
    %c0_10 = arith.constant 0 : index
    %c0_11 = arith.constant 0 : index
    %c0_12 = arith.constant 0 : index
    %18 = vector.load %arg5[%c0_10, %c0_11, %c0_12] : memref<2x128x128xbf16, #tpu.memory_space<vmem>>, vector<1x128x128xbf16>
    %19 = vector.shape_cast %18 : vector<1x128x128xbf16> to vector<128x128xbf16>
    %cst_13 = arith.constant dense<0.000000e+00> : vector<16x128xf32>
    %20 = tpu.matmul %17, %19, %cst_13 {dimension_numbers = #tpu.dot_dimension_numbers<[1], [0], [0], [1], [0, 0, 1, 1], [], []>} : vector<16x128xbf16>, vector<128x128xbf16>, vector<16x128xf32> -> vector<16x128xf32>
    %21 = vector.extract_strided_slice %20 {offsets = [0, 0], sizes = [16, 8], strides = [1, 1]} : vector<16x128xf32> to vector<16x8xf32>
    %22 = vector.extract_strided_slice %20 {offsets = [0, 8], sizes = [16, 8], strides = [1, 1]} : vector<16x128xf32> to vector<16x8xf32>
    %23 = vector.extract_strided_slice %20 {offsets = [0, 16], sizes = [16, 8], strides = [1, 1]} : vector<16x128xf32> to vector<16x8xf32>
    %24 = vector.extract_strided_slice %20 {offsets = [0, 24], sizes = [16, 8], strides = [1, 1]} : vector<16x128xf32> to vector<16x8xf32>
    %25 = vector.shape_cast %21 : vector<16x8xf32> to vector<1x16x8xf32>
    %26 = vector.shape_cast %22 : vector<16x8xf32> to vector<1x16x8xf32>
    %27 = vector.shape_cast %23 : vector<16x8xf32> to vector<1x16x8xf32>
    %28 = vector.shape_cast %24 : vector<16x8xf32> to vector<1x16x8xf32>
    %29 = tpu.concatenate %25, %26, %27, %28 in 0 : vector<1x16x8xf32>, vector<1x16x8xf32>, vector<1x16x8xf32>, vector<1x16x8xf32> -> vector<4x16x8xf32>
    %30 = vector.shape_cast %29 : vector<4x16x8xf32> to vector<8x8x8xf32>
    %31 = arith.truncf %30 : vector<8x8x8xf32> to vector<8x8x8xbf16>
    %32 = vector.extract_strided_slice %20 {offsets = [0, 32], sizes = [16, 8], strides = [1, 1]} : vector<16x128xf32> to vector<16x8xf32>
    %33 = vector.extract_strided_slice %20 {offsets = [0, 40], sizes = [16, 8], strides = [1, 1]} : vector<16x128xf32> to vector<16x8xf32>
    %34 = vector.extract_strided_slice %20 {offsets = [0, 48], sizes = [16, 8], strides = [1, 1]} : vector<16x128xf32> to vector<16x8xf32>
    %35 = vector.extract_strided_slice %20 {offsets = [0, 56], sizes = [16, 8], strides = [1, 1]} : vector<16x128xf32> to vector<16x8xf32>
    %36 = vector.shape_cast %32 : vector<16x8xf32> to vector<1x16x8xf32>
    %37 = vector.shape_cast %33 : vector<16x8xf32> to vector<1x16x8xf32>
    %38 = vector.shape_cast %34 : vector<16x8xf32> to vector<1x16x8xf32>
    %39 = vector.shape_cast %35 : vector<16x8xf32> to vector<1x16x8xf32>
    %40 = tpu.concatenate %36, %37, %38, %39 in 0 : vector<1x16x8xf32>, vector<1x16x8xf32>, vector<1x16x8xf32>, vector<1x16x8xf32> -> vector<4x16x8xf32>
    %41 = vector.shape_cast %40 : vector<4x16x8xf32> to vector<8x8x8xf32>
    %42 = arith.truncf %41 : vector<8x8x8xf32> to vector<8x8x8xbf16>
    %43 = vector.extract_strided_slice %20 {offsets = [0, 64], sizes = [16, 8], strides = [1, 1]} : vector<16x128xf32> to vector<16x8xf32>
    %44 = vector.extract_strided_slice %20 {offsets = [0, 72], sizes = [16, 8], strides = [1, 1]} : vector<16x128xf32> to vector<16x8xf32>
    %45 = vector.extract_strided_slice %20 {offsets = [0, 80], sizes = [16, 8], strides = [1, 1]} : vector<16x128xf32> to vector<16x8xf32>
    %46 = vector.extract_strided_slice %20 {offsets = [0, 88], sizes = [16, 8], strides = [1, 1]} : vector<16x128xf32> to vector<16x8xf32>
    %47 = vector.shape_cast %43 : vector<16x8xf32> to vector<1x16x8xf32>
    %48 = vector.shape_cast %44 : vector<16x8xf32> to vector<1x16x8xf32>
    %49 = vector.shape_cast %45 : vector<16x8xf32> to vector<1x16x8xf32>
    %50 = vector.shape_cast %46 : vector<16x8xf32> to vector<1x16x8xf32>
    %51 = tpu.concatenate %47, %48, %49, %50 in 0 : vector<1x16x8xf32>, vector<1x16x8xf32>, vector<1x16x8xf32>, vector<1x16x8xf32> -> vector<4x16x8xf32>
    %52 = vector.shape_cast %51 : vector<4x16x8xf32> to vector<8x8x8xf32>
    %53 = arith.truncf %52 : vector<8x8x8xf32> to vector<8x8x8xbf16>
    "tpu.trace_start"() <{level = 10 : i32, message = "gqd,gkd->gqk"}> : () -> ()
    %cst_14 = arith.constant dense<0.000000e+00> : vector<8x8x8xf32>
    %54 = tpu.matmul %31, %42, %cst_14 {dimension_numbers = #tpu.dot_dimension_numbers<[2], [2], [1], [1], [0, 0, 0, 1, 1, 1], [0], [0]>} : vector<8x8x8xbf16>, vector<8x8x8xbf16>, vector<8x8x8xf32> -> vector<8x8x8xf32>
    "tpu.trace_stop"() : () -> ()
    %55 = arith.addf %54, %2 : vector<8x8x8xf32>
    %cst_15 = arith.constant dense<0xFF800000> : vector<8x8xf32>
    %56 = vector.multi_reduction <maximumf>, %55, %cst_15 [2] : vector<8x8x8xf32> to vector<8x8xf32>
    %57 = vector.shape_cast %56 : vector<8x8xf32> to vector<8x8x1xf32>
    %58 = vector.broadcast %57 : vector<8x8x1xf32> to vector<8x8x8xf32>
    %59 = arith.subf %55, %58 : vector<8x8x8xf32>
    %60 = math.exp %59 : vector<8x8x8xf32>
    %cst_16 = arith.constant dense<0.000000e+00> : vector<8x8xf32>
    %61 = vector.multi_reduction <add>, %60, %cst_16 [2] : vector<8x8x8xf32> to vector<8x8xf32>
    %62 = vector.shape_cast %61 : vector<8x8xf32> to vector<8x8x1xf32>
    %63 = tpu.reciprocal %62 {approx = true} : vector<8x8x1xf32> -> vector<8x8x1xf32>
    %64 = vector.broadcast %63 : vector<8x8x1xf32> to vector<8x8x8xf32>
    %65 = arith.mulf %60, %64 : vector<8x8x8xf32>
    %66 = arith.truncf %65 : vector<8x8x8xf32> to vector<8x8x8xbf16>
    "tpu.trace_start"() <{level = 10 : i32, message = "gqk,gkd->gqd"}> : () -> ()
    %cst_17 = arith.constant dense<0.000000e+00> : vector<8x8x8xf32>
    %67 = tpu.matmul %66, %53, %cst_17 {dimension_numbers = #tpu.dot_dimension_numbers<[2], [1], [1], [2], [0, 0, 0, 1, 1, 2], [0], [0]>} : vector<8x8x8xbf16>, vector<8x8x8xbf16>, vector<8x8x8xf32> -> vector<8x8x8xf32>
    "tpu.trace_stop"() : () -> ()
    %68 = vector.shape_cast %67 : vector<8x8x8xf32> to vector<4x16x8xf32>
    %69 = vector.extract_strided_slice %68 {offsets = [0, 0, 0], sizes = [1, 16, 8], strides = [1, 1, 1]} : vector<4x16x8xf32> to vector<1x16x8xf32>
    %70 = vector.shape_cast %69 : vector<1x16x8xf32> to vector<16x8xf32>
    %71 = vector.extract_strided_slice %68 {offsets = [1, 0, 0], sizes = [1, 16, 8], strides = [1, 1, 1]} : vector<4x16x8xf32> to vector<1x16x8xf32>
    %72 = vector.shape_cast %71 : vector<1x16x8xf32> to vector<16x8xf32>
    %73 = vector.extract_strided_slice %68 {offsets = [2, 0, 0], sizes = [1, 16, 8], strides = [1, 1, 1]} : vector<4x16x8xf32> to vector<1x16x8xf32>
    %74 = vector.shape_cast %73 : vector<1x16x8xf32> to vector<16x8xf32>
    %75 = vector.extract_strided_slice %68 {offsets = [3, 0, 0], sizes = [1, 16, 8], strides = [1, 1, 1]} : vector<4x16x8xf32> to vector<1x16x8xf32>
    %76 = vector.shape_cast %75 : vector<1x16x8xf32> to vector<16x8xf32>
    %77 = tpu.concatenate %70, %72, %74, %76 in 1 : vector<16x8xf32>, vector<16x8xf32>, vector<16x8xf32>, vector<16x8xf32> -> vector<16x32xf32>
    %78 = arith.truncf %77 : vector<16x32xf32> to vector<16x32xbf16>
    %c0_18 = arith.constant 0 : index
    %c0_19 = arith.constant 0 : index
    %c0_20 = arith.constant 0 : index
    %79 = vector.load %arg6[%c0_18, %c0_19, %c0_20] : memref<2x32x128xbf16, #tpu.memory_space<vmem>>, vector<1x32x128xbf16>
    %80 = vector.shape_cast %79 : vector<1x32x128xbf16> to vector<32x128xbf16>
    %cst_21 = arith.constant dense<0.000000e+00> : vector<16x128xf32>
    %81 = tpu.matmul %78, %80, %cst_21 {dimension_numbers = #tpu.dot_dimension_numbers<[1], [0], [0], [1], [0, 0, 1, 1], [], []>} : vector<16x32xbf16>, vector<32x128xbf16>, vector<16x128xf32> -> vector<16x128xf32>
    %82 = arith.addf %1, %81 : vector<16x128xf32>
    %c0_22 = arith.constant 0 : index
    %c0_23 = arith.constant 0 : index
    %c0_24 = arith.constant 0 : index
    %83 = vector.load %arg3[%c0_22, %c0_23, %c0_24] : memref<2x1x128xf32, #tpu.memory_space<vmem>>, vector<1x1x128xf32>
    %84 = vector.shape_cast %83 : vector<1x1x128xf32> to vector<1x128xf32>
    %85 = arith.mulf %82, %82 : vector<16x128xf32>
    %cst_25 = arith.constant dense<0.000000e+00> : vector<16xf32>
    %86 = vector.multi_reduction <add>, %85, %cst_25 [1] : vector<16x128xf32> to vector<16xf32>
    %87 = vector.shape_cast %86 : vector<16xf32> to vector<16x1xf32>
    %cst_26 = arith.constant 3.125000e-02 : f32
    %88 = vector.broadcast %cst_26 : f32 to vector<16x1xf32>
    %89 = arith.mulf %87, %88 : vector<16x1xf32>
    %cst_27 = arith.constant 9.99999997E-7 : f32
    %90 = vector.broadcast %cst_27 : f32 to vector<16x1xf32>
    %91 = arith.addf %89, %90 : vector<16x1xf32>
    %92 = math.rsqrt %91 : vector<16x1xf32>
    %93 = vector.broadcast %92 : vector<16x1xf32> to vector<16x128xf32>
    %94 = arith.mulf %82, %93 : vector<16x128xf32>
    %95 = vector.broadcast %84 : vector<1x128xf32> to vector<16x128xf32>
    %96 = arith.mulf %94, %95 : vector<16x128xf32>
    %97 = arith.truncf %96 : vector<16x128xf32> to vector<16x128xbf16>
    %c0_28 = arith.constant 0 : index
    %c0_29 = arith.constant 0 : index
    %c0_30 = arith.constant 0 : index
    %98 = vector.load %arg7[%c0_28, %c0_29, %c0_30] : memref<2x128x128xbf16, #tpu.memory_space<vmem>>, vector<1x128x128xbf16>
    %99 = vector.shape_cast %98 : vector<1x128x128xbf16> to vector<128x128xbf16>
    %cst_31 = arith.constant dense<0.000000e+00> : vector<16x128xf32>
    %100 = tpu.matmul %97, %99, %cst_31 {dimension_numbers = #tpu.dot_dimension_numbers<[1], [0], [0], [1], [0, 0, 1, 1], [], []>} : vector<16x128xbf16>, vector<128x128xbf16>, vector<16x128xf32> -> vector<16x128xf32>
    %cst_32 = arith.constant 0.000000e+00 : f32
    %101 = vector.broadcast %cst_32 : f32 to vector<16x128xf32>
    %102 = arith.maximumf %100, %101 : vector<16x128xf32>
    %103 = arith.truncf %102 : vector<16x128xf32> to vector<16x128xbf16>
    %c0_33 = arith.constant 0 : index
    %c0_34 = arith.constant 0 : index
    %c0_35 = arith.constant 0 : index
    %104 = vector.load %arg8[%c0_33, %c0_34, %c0_35] : memref<2x128x128xbf16, #tpu.memory_space<vmem>>, vector<1x128x128xbf16>
    %105 = vector.shape_cast %104 : vector<1x128x128xbf16> to vector<128x128xbf16>
    %cst_36 = arith.constant dense<0.000000e+00> : vector<16x128xf32>
    %106 = tpu.matmul %103, %105, %cst_36 {dimension_numbers = #tpu.dot_dimension_numbers<[1], [0], [0], [1], [0, 0, 1, 1], [], []>} : vector<16x128xbf16>, vector<128x128xbf16>, vector<16x128xf32> -> vector<16x128xf32>
    %107 = arith.addf %82, %106 : vector<16x128xf32>
    %c1 = arith.constant 1 : index
    %c0_37 = arith.constant 0 : index
    %c0_38 = arith.constant 0 : index
    %108 = vector.load %arg2[%c1, %c0_37, %c0_38] : memref<2x1x128xf32, #tpu.memory_space<vmem>>, vector<1x1x128xf32>
    %109 = vector.shape_cast %108 : vector<1x1x128xf32> to vector<1x128xf32>
    %110 = arith.mulf %107, %107 : vector<16x128xf32>
    %cst_39 = arith.constant dense<0.000000e+00> : vector<16xf32>
    %111 = vector.multi_reduction <add>, %110, %cst_39 [1] : vector<16x128xf32> to vector<16xf32>
    %112 = vector.shape_cast %111 : vector<16xf32> to vector<16x1xf32>
    %cst_40 = arith.constant 3.125000e-02 : f32
    %113 = vector.broadcast %cst_40 : f32 to vector<16x1xf32>
    %114 = arith.mulf %112, %113 : vector<16x1xf32>
    %cst_41 = arith.constant 9.99999997E-7 : f32
    %115 = vector.broadcast %cst_41 : f32 to vector<16x1xf32>
    %116 = arith.addf %114, %115 : vector<16x1xf32>
    %117 = math.rsqrt %116 : vector<16x1xf32>
    %118 = vector.broadcast %117 : vector<16x1xf32> to vector<16x128xf32>
    %119 = arith.mulf %107, %118 : vector<16x128xf32>
    %120 = vector.broadcast %109 : vector<1x128xf32> to vector<16x128xf32>
    %121 = arith.mulf %119, %120 : vector<16x128xf32>
    %122 = arith.truncf %121 : vector<16x128xf32> to vector<16x128xbf16>
    %c1_42 = arith.constant 1 : index
    %c0_43 = arith.constant 0 : index
    %c0_44 = arith.constant 0 : index
    %123 = vector.load %arg5[%c1_42, %c0_43, %c0_44] : memref<2x128x128xbf16, #tpu.memory_space<vmem>>, vector<1x128x128xbf16>
    %124 = vector.shape_cast %123 : vector<1x128x128xbf16> to vector<128x128xbf16>
    %cst_45 = arith.constant dense<0.000000e+00> : vector<16x128xf32>
    %125 = tpu.matmul %122, %124, %cst_45 {dimension_numbers = #tpu.dot_dimension_numbers<[1], [0], [0], [1], [0, 0, 1, 1], [], []>} : vector<16x128xbf16>, vector<128x128xbf16>, vector<16x128xf32> -> vector<16x128xf32>
    %126 = vector.extract_strided_slice %125 {offsets = [0, 0], sizes = [16, 8], strides = [1, 1]} : vector<16x128xf32> to vector<16x8xf32>
    %127 = vector.extract_strided_slice %125 {offsets = [0, 8], sizes = [16, 8], strides = [1, 1]} : vector<16x128xf32> to vector<16x8xf32>
    %128 = vector.extract_strided_slice %125 {offsets = [0, 16], sizes = [16, 8], strides = [1, 1]} : vector<16x128xf32> to vector<16x8xf32>
    %129 = vector.extract_strided_slice %125 {offsets = [0, 24], sizes = [16, 8], strides = [1, 1]} : vector<16x128xf32> to vector<16x8xf32>
    %130 = vector.shape_cast %126 : vector<16x8xf32> to vector<1x16x8xf32>
    %131 = vector.shape_cast %127 : vector<16x8xf32> to vector<1x16x8xf32>
    %132 = vector.shape_cast %128 : vector<16x8xf32> to vector<1x16x8xf32>
    %133 = vector.shape_cast %129 : vector<16x8xf32> to vector<1x16x8xf32>
    %134 = tpu.concatenate %130, %131, %132, %133 in 0 : vector<1x16x8xf32>, vector<1x16x8xf32>, vector<1x16x8xf32>, vector<1x16x8xf32> -> vector<4x16x8xf32>
    %135 = vector.shape_cast %134 : vector<4x16x8xf32> to vector<8x8x8xf32>
    %136 = arith.truncf %135 : vector<8x8x8xf32> to vector<8x8x8xbf16>
    %137 = vector.extract_strided_slice %125 {offsets = [0, 32], sizes = [16, 8], strides = [1, 1]} : vector<16x128xf32> to vector<16x8xf32>
    %138 = vector.extract_strided_slice %125 {offsets = [0, 40], sizes = [16, 8], strides = [1, 1]} : vector<16x128xf32> to vector<16x8xf32>
    %139 = vector.extract_strided_slice %125 {offsets = [0, 48], sizes = [16, 8], strides = [1, 1]} : vector<16x128xf32> to vector<16x8xf32>
    %140 = vector.extract_strided_slice %125 {offsets = [0, 56], sizes = [16, 8], strides = [1, 1]} : vector<16x128xf32> to vector<16x8xf32>
    %141 = vector.shape_cast %137 : vector<16x8xf32> to vector<1x16x8xf32>
    %142 = vector.shape_cast %138 : vector<16x8xf32> to vector<1x16x8xf32>
    %143 = vector.shape_cast %139 : vector<16x8xf32> to vector<1x16x8xf32>
    %144 = vector.shape_cast %140 : vector<16x8xf32> to vector<1x16x8xf32>
    %145 = tpu.concatenate %141, %142, %143, %144 in 0 : vector<1x16x8xf32>, vector<1x16x8xf32>, vector<1x16x8xf32>, vector<1x16x8xf32> -> vector<4x16x8xf32>
    %146 = vector.shape_cast %145 : vector<4x16x8xf32> to vector<8x8x8xf32>
    %147 = arith.truncf %146 : vector<8x8x8xf32> to vector<8x8x8xbf16>
    %148 = vector.extract_strided_slice %125 {offsets = [0, 64], sizes = [16, 8], strides = [1, 1]} : vector<16x128xf32> to vector<16x8xf32>
    %149 = vector.extract_strided_slice %125 {offsets = [0, 72], sizes = [16, 8], strides = [1, 1]} : vector<16x128xf32> to vector<16x8xf32>
    %150 = vector.extract_strided_slice %125 {offsets = [0, 80], sizes = [16, 8], strides = [1, 1]} : vector<16x128xf32> to vector<16x8xf32>
    %151 = vector.extract_strided_slice %125 {offsets = [0, 88], sizes = [16, 8], strides = [1, 1]} : vector<16x128xf32> to vector<16x8xf32>
    %152 = vector.shape_cast %148 : vector<16x8xf32> to vector<1x16x8xf32>
    %153 = vector.shape_cast %149 : vector<16x8xf32> to vector<1x16x8xf32>
    %154 = vector.shape_cast %150 : vector<16x8xf32> to vector<1x16x8xf32>
    %155 = vector.shape_cast %151 : vector<16x8xf32> to vector<1x16x8xf32>
    %156 = tpu.concatenate %152, %153, %154, %155 in 0 : vector<1x16x8xf32>, vector<1x16x8xf32>, vector<1x16x8xf32>, vector<1x16x8xf32> -> vector<4x16x8xf32>
    %157 = vector.shape_cast %156 : vector<4x16x8xf32> to vector<8x8x8xf32>
    %158 = arith.truncf %157 : vector<8x8x8xf32> to vector<8x8x8xbf16>
    "tpu.trace_start"() <{level = 10 : i32, message = "gqd,gkd->gqk"}> : () -> ()
    %cst_46 = arith.constant dense<0.000000e+00> : vector<8x8x8xf32>
    %159 = tpu.matmul %136, %147, %cst_46 {dimension_numbers = #tpu.dot_dimension_numbers<[2], [2], [1], [1], [0, 0, 0, 1, 1, 1], [0], [0]>} : vector<8x8x8xbf16>, vector<8x8x8xbf16>, vector<8x8x8xf32> -> vector<8x8x8xf32>
    "tpu.trace_stop"() : () -> ()
    %160 = arith.addf %159, %2 : vector<8x8x8xf32>
    %cst_47 = arith.constant dense<0xFF800000> : vector<8x8xf32>
    %161 = vector.multi_reduction <maximumf>, %160, %cst_47 [2] : vector<8x8x8xf32> to vector<8x8xf32>
    %162 = vector.shape_cast %161 : vector<8x8xf32> to vector<8x8x1xf32>
    %163 = vector.broadcast %162 : vector<8x8x1xf32> to vector<8x8x8xf32>
    %164 = arith.subf %160, %163 : vector<8x8x8xf32>
    %165 = math.exp %164 : vector<8x8x8xf32>
    %cst_48 = arith.constant dense<0.000000e+00> : vector<8x8xf32>
    %166 = vector.multi_reduction <add>, %165, %cst_48 [2] : vector<8x8x8xf32> to vector<8x8xf32>
    %167 = vector.shape_cast %166 : vector<8x8xf32> to vector<8x8x1xf32>
    %168 = tpu.reciprocal %167 {approx = true} : vector<8x8x1xf32> -> vector<8x8x1xf32>
    %169 = vector.broadcast %168 : vector<8x8x1xf32> to vector<8x8x8xf32>
    %170 = arith.mulf %165, %169 : vector<8x8x8xf32>
    %171 = arith.truncf %170 : vector<8x8x8xf32> to vector<8x8x8xbf16>
    "tpu.trace_start"() <{level = 10 : i32, message = "gqk,gkd->gqd"}> : () -> ()
    %cst_49 = arith.constant dense<0.000000e+00> : vector<8x8x8xf32>
    %172 = tpu.matmul %171, %158, %cst_49 {dimension_numbers = #tpu.dot_dimension_numbers<[2], [1], [1], [2], [0, 0, 0, 1, 1, 2], [0], [0]>} : vector<8x8x8xbf16>, vector<8x8x8xbf16>, vector<8x8x8xf32> -> vector<8x8x8xf32>
    "tpu.trace_stop"() : () -> ()
    %173 = vector.shape_cast %172 : vector<8x8x8xf32> to vector<4x16x8xf32>
    %174 = vector.extract_strided_slice %173 {offsets = [0, 0, 0], sizes = [1, 16, 8], strides = [1, 1, 1]} : vector<4x16x8xf32> to vector<1x16x8xf32>
    %175 = vector.shape_cast %174 : vector<1x16x8xf32> to vector<16x8xf32>
    %176 = vector.extract_strided_slice %173 {offsets = [1, 0, 0], sizes = [1, 16, 8], strides = [1, 1, 1]} : vector<4x16x8xf32> to vector<1x16x8xf32>
    %177 = vector.shape_cast %176 : vector<1x16x8xf32> to vector<16x8xf32>
    %178 = vector.extract_strided_slice %173 {offsets = [2, 0, 0], sizes = [1, 16, 8], strides = [1, 1, 1]} : vector<4x16x8xf32> to vector<1x16x8xf32>
    %179 = vector.shape_cast %178 : vector<1x16x8xf32> to vector<16x8xf32>
    %180 = vector.extract_strided_slice %173 {offsets = [3, 0, 0], sizes = [1, 16, 8], strides = [1, 1, 1]} : vector<4x16x8xf32> to vector<1x16x8xf32>
    %181 = vector.shape_cast %180 : vector<1x16x8xf32> to vector<16x8xf32>
    %182 = tpu.concatenate %175, %177, %179, %181 in 1 : vector<16x8xf32>, vector<16x8xf32>, vector<16x8xf32>, vector<16x8xf32> -> vector<16x32xf32>
    %183 = arith.truncf %182 : vector<16x32xf32> to vector<16x32xbf16>
    %c1_50 = arith.constant 1 : index
    %c0_51 = arith.constant 0 : index
    %c0_52 = arith.constant 0 : index
    %184 = vector.load %arg6[%c1_50, %c0_51, %c0_52] : memref<2x32x128xbf16, #tpu.memory_space<vmem>>, vector<1x32x128xbf16>
    %185 = vector.shape_cast %184 : vector<1x32x128xbf16> to vector<32x128xbf16>
    %cst_53 = arith.constant dense<0.000000e+00> : vector<16x128xf32>
    %186 = tpu.matmul %183, %185, %cst_53 {dimension_numbers = #tpu.dot_dimension_numbers<[1], [0], [0], [1], [0, 0, 1, 1], [], []>} : vector<16x32xbf16>, vector<32x128xbf16>, vector<16x128xf32> -> vector<16x128xf32>
    %187 = arith.addf %107, %186 : vector<16x128xf32>
    %c1_54 = arith.constant 1 : index
    %c0_55 = arith.constant 0 : index
    %c0_56 = arith.constant 0 : index
    %188 = vector.load %arg3[%c1_54, %c0_55, %c0_56] : memref<2x1x128xf32, #tpu.memory_space<vmem>>, vector<1x1x128xf32>
    %189 = vector.shape_cast %188 : vector<1x1x128xf32> to vector<1x128xf32>
    %190 = arith.mulf %187, %187 : vector<16x128xf32>
    %cst_57 = arith.constant dense<0.000000e+00> : vector<16xf32>
    %191 = vector.multi_reduction <add>, %190, %cst_57 [1] : vector<16x128xf32> to vector<16xf32>
    %192 = vector.shape_cast %191 : vector<16xf32> to vector<16x1xf32>
    %cst_58 = arith.constant 3.125000e-02 : f32
    %193 = vector.broadcast %cst_58 : f32 to vector<16x1xf32>
    %194 = arith.mulf %192, %193 : vector<16x1xf32>
    %cst_59 = arith.constant 9.99999997E-7 : f32
    %195 = vector.broadcast %cst_59 : f32 to vector<16x1xf32>
    %196 = arith.addf %194, %195 : vector<16x1xf32>
    %197 = math.rsqrt %196 : vector<16x1xf32>
    %198 = vector.broadcast %197 : vector<16x1xf32> to vector<16x128xf32>
    %199 = arith.mulf %187, %198 : vector<16x128xf32>
    %200 = vector.broadcast %189 : vector<1x128xf32> to vector<16x128xf32>
    %201 = arith.mulf %199, %200 : vector<16x128xf32>
    %202 = arith.truncf %201 : vector<16x128xf32> to vector<16x128xbf16>
    %c1_60 = arith.constant 1 : index
    %c0_61 = arith.constant 0 : index
    %c0_62 = arith.constant 0 : index
    %203 = vector.load %arg7[%c1_60, %c0_61, %c0_62] : memref<2x128x128xbf16, #tpu.memory_space<vmem>>, vector<1x128x128xbf16>
    %204 = vector.shape_cast %203 : vector<1x128x128xbf16> to vector<128x128xbf16>
    %cst_63 = arith.constant dense<0.000000e+00> : vector<16x128xf32>
    %205 = tpu.matmul %202, %204, %cst_63 {dimension_numbers = #tpu.dot_dimension_numbers<[1], [0], [0], [1], [0, 0, 1, 1], [], []>} : vector<16x128xbf16>, vector<128x128xbf16>, vector<16x128xf32> -> vector<16x128xf32>
    %cst_64 = arith.constant 0.000000e+00 : f32
    %206 = vector.broadcast %cst_64 : f32 to vector<16x128xf32>
    %207 = arith.maximumf %205, %206 : vector<16x128xf32>
    %208 = arith.truncf %207 : vector<16x128xf32> to vector<16x128xbf16>
    %c1_65 = arith.constant 1 : index
    %c0_66 = arith.constant 0 : index
    %c0_67 = arith.constant 0 : index
    %209 = vector.load %arg8[%c1_65, %c0_66, %c0_67] : memref<2x128x128xbf16, #tpu.memory_space<vmem>>, vector<1x128x128xbf16>
    %210 = vector.shape_cast %209 : vector<1x128x128xbf16> to vector<128x128xbf16>
    %cst_68 = arith.constant dense<0.000000e+00> : vector<16x128xf32>
    %211 = tpu.matmul %208, %210, %cst_68 {dimension_numbers = #tpu.dot_dimension_numbers<[1], [0], [0], [1], [0, 0, 1, 1], [], []>} : vector<16x128xbf16>, vector<128x128xbf16>, vector<16x128xf32> -> vector<16x128xf32>
    %212 = arith.addf %187, %211 : vector<16x128xf32>
    %c0_69 = arith.constant 0 : index
    %c0_70 = arith.constant 0 : index
    %213 = vector.load %arg4[%c0_69, %c0_70] : memref<1x128xf32, #tpu.memory_space<vmem>>, vector<1x128xf32>
    %214 = arith.mulf %212, %212 : vector<16x128xf32>
    %cst_71 = arith.constant dense<0.000000e+00> : vector<16xf32>
    %215 = vector.multi_reduction <add>, %214, %cst_71 [1] : vector<16x128xf32> to vector<16xf32>
    %216 = vector.shape_cast %215 : vector<16xf32> to vector<16x1xf32>
    %cst_72 = arith.constant 3.125000e-02 : f32
    %217 = vector.broadcast %cst_72 : f32 to vector<16x1xf32>
    %218 = arith.mulf %216, %217 : vector<16x1xf32>
    %cst_73 = arith.constant 9.99999997E-7 : f32
    %219 = vector.broadcast %cst_73 : f32 to vector<16x1xf32>
    %220 = arith.addf %218, %219 : vector<16x1xf32>
    %221 = math.rsqrt %220 : vector<16x1xf32>
    %222 = vector.broadcast %221 : vector<16x1xf32> to vector<16x128xf32>
    %223 = arith.mulf %212, %222 : vector<16x128xf32>
    %224 = vector.broadcast %213 : vector<1x128xf32> to vector<16x128xf32>
    %225 = arith.mulf %223, %224 : vector<16x128xf32>
    %226 = vector.shape_cast %225 : vector<16x128xf32> to vector<2x8x128xf32>
    %c0_74 = arith.constant 0 : index
    %c0_75 = arith.constant 0 : index
    %c0_76 = arith.constant 0 : index
    %227 = vector.load %arg9[%c0_74, %c0_75, %c0_76] : memref<2x8x128xf32, #tpu.memory_space<vmem>>, vector<2x8x128xf32>
    tpu.vector_store %arg9[%c0_74, %c0_75, %c0_76], %226 {strides = array<i32>} : memref<2x8x128xf32, #tpu.memory_space<vmem>>, vector<2x8x128xf32>,
    return
  }
}

</mosaic_0001>

<bundles_post_ra>
// kernel: tpu_custom_call.1
= control target key start
LH: loop header
LB: loop body
LE: loop exit
PB: predicated region body
PF: predicated region fallthrough
CT: control target
= control target key end

     0   :  { %14 = vsyncpa [#allocation3], 0  ;;  %s4542_s0 = inlined_call_operand.hbm [shape: f32[2,8,128], index: 0, kind: input, shape index: {}]   ;;  %s4543_s1 = inlined_call_operand.hbm [shape: f32[8,8,8], index: 1, kind: input, shape index: {}]   ;;  %s4544_s2 = inlined_call_operand.vmem [shape: f32[2,1,128], index: 2, kind: input, shape index: {}]   ;;  %s4545_s3 = inlined_call_operand.vmem [shape: f32[2,1,128], index: 3, kind: input, shape index: {}]   ;;  %s4546_s4 = inlined_call_operand.vmem [shape: f32[1,128], index: 4, kind: input, shape index: {}]   ;;  %s4547_s5 = inlined_call_operand.hbm [shape: bf16[2,128,128], index: 5, kind: input, shape index: {}]   ;;  %s4548_s6 = inlined_call_operand.hbm [shape: bf16[2,32,128], index: 6, kind: input, shape index: {}]   ;;  %s4549_s7 = inlined_call_operand.hbm [shape: bf16[2,128,128], index: 7, kind: input, shape index: {}]   ;;  %s4550_s8 = inlined_call_operand.hbm [shape: bf16[2,128,128], index: 8, kind: input, shape index: {}]   ;;  %s4551_s9 = inlined_call_operand.hbm [shape: f32[2,8,128], index: 9, kind: output, shape index: {}]  }
   0x1   :  { %15 = vsyncpa [#allocation6], 0 }
   0x2   :  { %16 = vsyncpa [#allocation9], 0 }
   0x3   :  { %17 = vsyncpa [#allocation12], 0 }
   0x4   :  { %18 = vsyncpa [#allocation4], 0  ;;  %s3820_s30 = smov [#allocation5]   ;;  %s3656_s13 = scalar_lea.hbm %s4543_s1, 1024 }
   0x5   :  { %s36_s10 = sshll.u32 %s3820_s30, 4  ;;  %p3657_p0 = scmp.ne.s32.totalorder %s4543_s1, %s3656_s13  ;;  %s37_s10 = int_to_ptr.vmem [resolvable:$true] %s36_s10 }
   0x6   :  { %p3660_p1 = scmp.lt.u32.totalorder %s3656_s13, %s4543_s1 }
   0x8   :  { %p3662_p2 = pnand %p3660_p1, %p3657_p0 }
   0xa   :  { %3665 = shalt.err (!%p3662_p2)
}
   0xb   :  { %s3666_s18 = scalar_lea.vmem %s37_s10, 1024  ;;  %p3671_p4 = scmp.lt.s32.totalorder %s37_s10, %s37_s10 }
   0xc   :  { %p3667_p3 = scmp.ne.s32.totalorder %s37_s10, %s3666_s18  ;;  %p3672_p5 = scmp.lt.s32.totalorder %s3666_s18, %s3666_s18 }
   0xe   :  { %p3673_p6 = por %p3672_p5, %p3671_p4 }
  0x10   :  { %p3674_p7 = pnand %p3673_p6, %p3667_p3 }
  0x12   :  { %3677 = shalt.err (!%p3674_p7)
}
  0x13   :  { %s3821_s19 = smov 128   ;;  %s3822_s20 = smov 8  }
  0x14   :  { %42 = dma.hbm_to_vmem [thread:$0]  %s4543_s1, 1024, %s37_s10, [#allocation6], %s3821_s19, %s3821_s19, %s3822_s20  }
  0x15   :  { %s3823_s23 = smov [#allocation8]   ;;  %s3824_s25 = smov [#allocation2]  }
  0x16   :  { %s66_s24 = sshll.u32 %s3823_s23, 4  ;;  %s24_s26 = sshll.u32 %s3824_s25, 4  ;;  %s67_s24 = int_to_ptr.vmem [resolvable:$true] %s66_s24  ;;  %s25_s26 = int_to_ptr.vmem [resolvable:$true] %s24_s26 }
  0x17   :  { %s3678_s29 = scalar_lea.hbm %s4548_s6, 512 }
  0x18   :  { %p3679_p8 = scmp.ne.s32.totalorder %s4548_s6, %s3678_s29  ;;  %p3682_p9 = scmp.lt.u32.totalorder %s3678_s29, %s4548_s6 }
  0x1a   :  { %p3684_p10 = pnand %p3682_p9, %p3679_p8 }
  0x1c   :  { %3687 = shalt.err (!%p3684_p10)
}
  0x1d   :  { %s3688_s1 = scalar_lea.vmem %s67_s24, 512  ;;  %p3693_p12 = scmp.lt.s32.totalorder %s67_s24, %s67_s24 }
  0x1e   :  { %p3689_p11 = scmp.ne.s32.totalorder %s67_s24, %s3688_s1  ;;  %p3694_p13 = scmp.lt.s32.totalorder %s3688_s1, %s3688_s1 }
  0x20   :  { %p3695_p0 = por %p3694_p13, %p3693_p12 }
  0x22   :  { %p3696_p1 = pnand %p3695_p0, %p3689_p11 }
  0x24   :  { %3699 = shalt.err (!%p3696_p1)
}
  0x25   :  { %s3825_s10 = smov 64   ;;  %s3826_s14 = smov 4  }
  0x26   :  { %72 = dma.hbm_to_vmem [thread:$0]  %s4548_s6, 512, %s67_s24, [#allocation9], %s3825_s10, %s3825_s10, %s3826_s14  }
  0x27   :  { %s3700_s21 = scalar_lea.hbm %s4542_s0, 256 }
  0x28   :  { %p3701_p2 = scmp.ne.s32.totalorder %s4542_s0, %s3700_s21  ;;  %p3704_p3 = scmp.lt.u32.totalorder %s3700_s21, %s4542_s0 }
  0x2a   :  { %p3706_p4 = pnand %p3704_p3, %p3701_p2 }
  0x2c   :  { %3709 = shalt.err (!%p3706_p4)
}
  0x2d   :  { %s3710_s28 = scalar_lea.vmem %s25_s26, 256  ;;  %p3715_p6 = scmp.lt.s32.totalorder %s25_s26, %s25_s26 }
  0x2e   :  { %p3711_p5 = scmp.ne.s32.totalorder %s25_s26, %s3710_s28  ;;  %p3716_p7 = scmp.lt.s32.totalorder %s3710_s28, %s3710_s28 }
  0x30   :  { %p3717_p8 = por %p3716_p7, %p3715_p6 }
  0x32   :  { %p3718_p9 = pnand %p3717_p8, %p3711_p5 }
  0x34   :  { %3721 = shalt.err (!%p3718_p9)
}
  0x35   :  { %30 = dma.hbm_to_vmem [thread:$0]  %s4542_s0, 256, %s25_s26, [#allocation3], %s3821_s19, %s3821_s19, %s3822_s20  }
  0x36   :  { %s3827_s29 = smov [#allocation7]   ;;  %s3828_s11 = smov [#allocation10]  }
  0x37   :  { %s54_s30 = sshll.u32 %s3827_s29, 4  ;;  %s78_s12 = sshll.u32 %s3828_s11, 4  ;;  %s55_s30 = int_to_ptr.vmem [resolvable:$true] %s54_s30  ;;  %s79_s12 = int_to_ptr.vmem [resolvable:$true] %s78_s12 }
  0x38   :  { %s3722_s15 = scalar_lea.hbm %s4547_s5, 2048 }
  0x39   :  { %p3723_p10 = scmp.ne.s32.totalorder %s4547_s5, %s3722_s15  ;;  %p3726_p11 = scmp.lt.u32.totalorder %s3722_s15, %s4547_s5 }
  0x3b   :  { %p3728_p12 = pnand %p3726_p11, %p3723_p10 }
  0x3d   :  { %3731 = shalt.err (!%p3728_p12)
}
  0x3e   :  { %s3732_s0 = scalar_lea.vmem %s55_s30, 2048  ;;  %p3737_p0 = scmp.lt.s32.totalorder %s55_s30, %s55_s30 }
  0x3f   :  { %p3733_p13 = scmp.ne.s32.totalorder %s55_s30, %s3732_s0  ;;  %p3738_p1 = scmp.lt.s32.totalorder %s3732_s0, %s3732_s0 }
  0x41   :  { %p3739_p2 = por %p3738_p1, %p3737_p0 }
  0x43   :  { %p3740_p3 = pnand %p3739_p2, %p3733_p13 }
  0x45   :  { %3743 = shalt.err (!%p3740_p3)
}
  0x46   :  { %60 = dma.hbm_to_vmem [thread:$0]  %s4547_s5, 2048, %s55_s30, [#allocation6], %s3825_s10, %s3825_s10, %s3826_s14  }
  0x47   :  { %s3744_s27 = scalar_lea.hbm %s4549_s7, 2048 }
  0x48   :  { %p3745_p4 = scmp.ne.s32.totalorder %s4549_s7, %s3744_s27  ;;  %p3748_p5 = scmp.lt.u32.totalorder %s3744_s27, %s4549_s7 }
  0x4a   :  { %p3750_p6 = pnand %p3748_p5, %p3745_p4 }
  0x4c   :  { %3753 = shalt.err (!%p3750_p6)
}
  0x4d   :  { %s3754_s11 = scalar_lea.vmem %s79_s12, 2048  ;;  %p3759_p8 = scmp.lt.s32.totalorder %s79_s12, %s79_s12 }
  0x4e   :  { %p3755_p7 = scmp.ne.s32.totalorder %s79_s12, %s3754_s11  ;;  %p3760_p9 = scmp.lt.s32.totalorder %s3754_s11, %s3754_s11 }
  0x50   :  { %p3761_p10 = por %p3760_p9, %p3759_p8 }
  0x52   :  { %p3762_p11 = pnand %p3761_p10, %p3755_p7 }
  0x54   :  { %3765 = shalt.err (!%p3762_p11)
}
  0x55   :  { %84 = dma.hbm_to_vmem [thread:$0]  %s4549_s7, 2048, %s79_s12, [#allocation9], %s3825_s10, %s3825_s10, %s3826_s14  }
  0x56   :  { %s3829_s13 = smov [#allocation11]   ;;  %s3766_s17 = scalar_lea.hbm %s4550_s8, 2048 }
  0x57   :  { %s90_s1 = sshll.u32 %s3829_s13, 4  ;;  %p3767_p12 = scmp.ne.s32.totalorder %s4550_s8, %s3766_s17  ;;  %s91_s1 = int_to_ptr.vmem [resolvable:$true] %s90_s1 }
  0x58   :  { %p3770_p13 = scmp.lt.u32.totalorder %s3766_s17, %s4550_s8 }
  0x5a   :  { %p3772_p0 = pnand %p3770_p13, %p3767_p12 }
  0x5c   :  { %3775 = shalt.err (!%p3772_p0)
}
  0x5d   :  { %s3776_s22 = scalar_lea.vmem %s91_s1, 2048  ;;  %p3781_p2 = scmp.lt.s32.totalorder %s91_s1, %s91_s1 }
  0x5e   :  { %p3777_p1 = scmp.ne.s32.totalorder %s91_s1, %s3776_s22  ;;  %p3782_p3 = scmp.lt.s32.totalorder %s3776_s22, %s3776_s22 }
  0x60   :  { %p3783_p4 = por %p3782_p3, %p3781_p2 }
  0x62   :  { %p3784_p5 = pnand %p3783_p4, %p3777_p1 }
  0x64   :  { %3787 = shalt.err (!%p3784_p5)
}
  0x65   :  { %96 = dma.hbm_to_vmem [thread:$0]  %s4550_s8, 2048, %s91_s1, [#allocation12], %s3825_s10, %s3825_s10, %s3826_s14  }
  0x66   :  { %3810 = dma.done.wait [#allocation3], 256  }
  0x67   :  { %3811 = vsyncadd [#allocation3], 4294967040 }
  0x68   :  { %3812 = dma.done.wait [#allocation6], 3072  }
  0x69   :  { %3813 = vsyncadd [#allocation6], 4294964224 }
  0x6a   :  { %3814 = dma.done.wait [#allocation9], 2560  }
  0x6b   :  { %3815 = vsyncadd [#allocation9], 4294964736 }
  0x6c   :  { %3816 = dma.done.wait [#allocation12], 2048  }
  0x6d   :  { %3817 = vsyncadd [#allocation12], 4294965248  ;;  %v3830_v0 = vmov 0.0   ;;  %v116_v1 = vld [vmem:[#allocation2] sm:$0xff]  ;;  %v117_v2 = vld [vmem:[#allocation2 + $0x8] sm:$0xff]  ;;  %vm3831_vm0 = vmmov 0  }
  0x6e   :  { %3121 = vmatprep.subr.bf16.mxu0 %v3830_v0  ;;  %3141 = vmatprep.subr.bf16.mxu1 %v3830_v0  ;;  %v127_v3 = vmul.f32 %v116_v1, %v116_v1  ;;  %v3518_v4 = vld [vmem:[#allocation7] sm:$0xff]   ;;  %v3519_v5 = vld [vmem:[#allocation7 + $0x8] sm:$0xff]   ;;  %v128_v6 = vmul.f32 %v117_v2, %v117_v2  ;;  %v3520_v7 = vld [vmem:[#allocation7 + $0x10] sm:$0xff]   ;;  %s3832_s23 = smov 120   ;;  %s3833_s25 = smov 112   ;;  %vm286_vm1 = vcmask 64512  }
  0x6f   :  { %3122 = vmatpush3.bf16.msra.mxu0 %v3518_v4  ;;  %v3521_v8 = vld [vmem:[#allocation7 + $0x18] sm:$0xff]   ;;  %v3522_v9 = vld [vmem:[#allocation7 + $0x20] sm:$0xff]   ;;  %v3523_v10 = vld [vmem:[#allocation7 + $0x28] sm:$0xff]   ;;  %3137 = vmatprep.mubr.msk.bf16.mxu0 %vm3831_vm0, %v3830_v0  ;;  %s3834_s27 = smov 104   ;;  %s3835_s28 = smov 96   ;;  %vm777_vm2 = vcmask 1043456  }
  0x70   :  { %129 = vadd.xlane.f32.xlu0 %v127_v3  ;;  %3123 = vmatprep.subr.bf16.mxu0 %v3830_v0  ;;  %v3524_v11 = vld [vmem:[#allocation7 + $0x30] sm:$0xff]   ;;  %v3525_v12 = vld [vmem:[#allocation7 + $0x38] sm:$0xff]   ;;  %s3836_s6 = smov 16   ;;  %s3837_s24 = smov 24   ;;  %vm1183_vm3 = vcmask 130048   ;;  %vm1186_vm4 = vcmask 195584  }
  0x71   :  { %3143 = vmatprep.mubr.msk.bf16.mxu1 %vm3831_vm0, %v3830_v0  ;;  %v2904_v22 = vld [vmem:[%s4544_s2] ss:$0 sm:$0xff]  ;;  %vm1206_vm5 = vcmask 261120   ;;  %s3838_s1 = smov [#allocation13]  }
  0x72   :  { %s2889_s15 = sshll.u32 %s3838_s1, 4  ;;  %s2890_s15 = int_to_ptr.vmem [resolvable:$true] %s2889_s15 }
  0x73   :  { %3124 = vmatpush3.bf16.msra.mxu0 %v3519_v5  ;;  %v4080_v5 = vld [vmem:[#allocation5] sm:$0xff]  ;;  %s3788_s16 = scalar_lea.vmem %s2890_s15, 256  ;;  %p3793_p7 = scmp.lt.s32.totalorder %s2890_s15, %s2890_s15 }
  0x74   :  { %131 = vadd.xlane.f32.xlu0 %v128_v6  ;;  %3125 = vmatprep.subr.bf16.mxu0 %v3830_v0  ;;  %p3789_p6 = scmp.ne.s32.totalorder %s2890_s15, %s3788_s16  ;;  %p3794_p8 = scmp.lt.s32.totalorder %s3788_s16, %s3788_s16 }
  0x76   :  { %p3795_p9 = por %p3794_p8, %p3793_p7 }
  0x77   :  { %3126 = vmatpush3.bf16.msra.mxu0 %v3520_v7 }
  0x78   :  { %3127 = vmatprep.subr.bf16.mxu0 %v3830_v0  ;;  %p3796_p10 = pnand %p3795_p9, %p3789_p6 }
  0x7b   :  { %3128 = vmatpush3.bf16.msra.mxu0 %v3521_v8 }
  0x7c   :  { %3129 = vmatprep.subr.bf16.mxu0 %v3830_v0 }
  0x7f   :  { %3130 = vmatpush3.bf16.msra.mxu0 %v3522_v9 }
  0x80   :  { %3131 = vmatprep.subr.bf16.mxu0 %v3830_v0 }
  0x83   :  { %3132 = vmatpush3.bf16.msra.mxu0 %v3523_v10 }
  0x84   :  { %3133 = vmatprep.subr.bf16.mxu0 %v3830_v0 }
  0x87   :  { %3134 = vmatpush3.bf16.msra.mxu0 %v3524_v11 }
  0x88   :  { %3135 = vmatprep.subr.bf16.mxu0 %v3830_v0 }
  0x8b   :  { %3136 = vmatpush3.bf16.msra.mxu0 %v3525_v12  ;;  %v4087_v12 = vld [vmem:[#allocation5 + $0x8] sm:$0xff] }
  0x8c   :  { %3165 = vmatprep.subr.bf16.mxu0 %v3830_v0 }
  0xfd   :  { %v130_v13 = vpop.xlane.xlu0 %129 }
  0xfe   :  { %v133_v14 = vmul.f32 0.03125, %v130_v13 }
 0x100   :  { %v135_v15 = vadd.f32 1e-06, %v133_v14 }
 0x101   :  { %v132_v16 = vpop.xlane.xlu0 %131 }
 0x102   :  { %3570 = vrsqrt.f32 %v135_v15  ;;  %v134_v17 = vmul.f32 0.03125, %v132_v16 }
 0x104   :  { %v136_v18 = vadd.f32 1e-06, %v134_v17 }
 0x106   :  { %3572 = vrsqrt.f32 %v136_v18 }
 0x10c   :  { %v3571_v19 = vpop.eup %3570 }
 0x10d   :  { %v139_v20 = vmul.f32 %v3571_v19, %v116_v1  ;;  %v4091_v19 = vld [vmem:[#allocation5 + $0x10] sm:$0xff] }
 0x10f   :  { %v147_v24 = vmul.f32 %v2904_v22, %v139_v20 }
 0x110   :  { %v3573_v21 = vpop.eup %3572 }
 0x111   :  { %v140_v23 = vmul.f32 %v3573_v21, %v117_v2 }
 0x113   :  { %v148_v25 = vmul.f32 %v2904_v22, %v140_v23 }
 0x115   :  { %v149_v26 = vpack.c.bf16 %v148_v25, %v147_v24 }
 0x117   :  { %3138 = vmatmul.mubr.bf16.vlgmr.msra.gmra.mrb[0].mxu0 %v149_v26  ;;  %v4098_v26 = vld [vmem:[#allocation5 + $0x18] sm:$0xff] }
 0x118   :  { %3167 = vmatprep.mubr.msk.bf16.mxu0 %vm3831_vm0, %v3830_v0 }
 0x1ea   :  { %v248_v27 = vpop.f32.mrb[0].mxu0 }
 0x1eb   :  { %257 = vrot.lane.b32.xlu1 %v248_v27, %s3832_s23  ;;  %v3139_v28 = vpop.f32.mrb[1].mxu0  ;;  %v275_v32 = vpack.c.bf16 %v248_v27, %v248_v27 }
 0x1ec   :  { %v251_v29 = vpop.f32.mrb[2].mxu0 }
 0x1ed   :  { %v3140_v30 = vpop.f32.mrb[3].mxu0  ;;  %v3468_v31 = vpack.i.bf16 %v251_v29, %v248_v27  ;;  %v276_v33 = vpack.c.bf16 %v251_v29, %v251_v29  ;;  %v4100_v27 = vld [vmem:[#allocation5 + $0x20] sm:$0xff] }
 0x1ef   :  { %3469 = vrot.lane.b32.xlu0 %v3468_v31, %s3833_s25  ;;  %259 = vrot.lane.b32.xlu1 %v251_v29, %s3832_s23 }
 0x1f3   :  { %3474 = vrot.lane.b32.xlu1 %v3468_v31, %s3834_s27 }
 0x1f7   :  { %284 = vrot.lane.b32.xlu1 %v275_v32, %s3835_s28 }
 0x1fb   :  { %334 = vrot.lane.b32.xlu1 %v276_v33, %s3835_s28 }
 0x25d   :  { %v258_v34 = vpop.permute.xlu1 %257 }
 0x25e   :  { %v4004_v35 = vpack.c.bf16 %v258_v34, %v258_v34 }
 0x260   :  { %383 = vrot.lane.b32.xlu1 %v4004_v35, %s3835_s28 }
 0x261   :  { %v3470_v36 = vpop.permute.xlu0 %3469  ;;  %v260_v37 = vpop.permute.xlu1 %259 }
 0x262   :  { %v3472_v38 = vunpack.i.h.bf16 %v3470_v36  ;;  %v3471_v39 = vunpack.i.l.bf16 %v3470_v36  ;;  %v4008_v40 = vpack.c.bf16 %v260_v37, %v260_v37 }
 0x264   :  { %v4010_v41 = vpack.c.bf16 %v3472_v38, %v3472_v38  ;;  %432 = vrot.lane.b32.xlu1 %v4008_v40, %s3835_s28  ;;  %v4014_v43 = vpack.c.bf16 %v3471_v39, %v3471_v39 }
 0x265   :  { %v3475_v42 = vpop.permute.xlu1 %3474 }
 0x266   :  { %v3477_v44 = vunpack.i.h.bf16 %v3475_v42  ;;  %v3476_v45 = vunpack.i.l.bf16 %v3475_v42  ;;  %530 = vrot.lane.b32.xlu0 %v4010_v41, %s3835_s28 }
 0x268   :  { %v4018_v46 = vpack.c.bf16 %v3477_v44, %v3477_v44  ;;  %481 = vrot.lane.b32.xlu1 %v4014_v43, %s3835_s28  ;;  %v4022_v48 = vpack.c.bf16 %v3476_v45, %v3476_v45  ;;  %v4109_v44 = vld [vmem:[#allocation5 + $0x28] sm:$0xff]  ;;  %v4111_v45 = vld [vmem:[#allocation5 + $0x30] sm:$0xff] }
 0x269   :  { %v285_v47 = vpop.permute.xlu1 %284 }
 0x26a   :  { %628 = vrot.lane.b32.xlu0 %v4018_v46, %s3835_s28  ;;  %v291_v49 = vsel %vm286_vm1, %v285_v47, 0 }
 0x26b   :  { %3142 = vmatpush3.bf16.xpose.msra.mxu1 %v291_v49 }
 0x26c   :  { %579 = vrot.lane.b32.xlu1 %v4022_v48, %s3835_s28  ;;  %3147 = vmatprep.subr.bf16.mxu1 %v3830_v0 }
 0x26d   :  { %v335_v50 = vpop.permute.xlu1 %334 }
 0x26e   :  { %772 = vrot.lane.b32.xlu0 %v275_v32, %s3825_s10  ;;  %v340_v51 = vsel %vm286_vm1, %v335_v50, 0 }
 0x270   :  { %821 = vrot.lane.b32.xlu1 %v276_v33, %s3825_s10 }
 0x272   :  { %3144 = vmatmul.mubr.msk.bf16.vlgmr.msra.gmra.mrb[0].mxu1 %vm286_vm1, %v275_v32 }
 0x273   :  { %3148 = vmatpush3.bf16.xpose.msra.mxu1 %v340_v51  ;;  %3149 = vmatprep.mubr.msk.bf16.mxu1 %vm3831_vm0, %v3830_v0 }
 0x274   :  { %3153 = vmatprep.subr.bf16.mxu1 %v3830_v0 }
 0x27a   :  { %3150 = vmatmul.mubr.msk.bf16.vlgmr.msra.gmra.mrb[4].mxu1 %vm286_vm1, %v276_v33 }
 0x27b   :  { %3155 = vmatprep.mubr.msk.bf16.mxu1 %vm3831_vm0, %v3830_v0 }
 0x2d2   :  { %v384_v52 = vpop.permute.xlu1 %383 }
 0x2d3   :  { %v389_v53 = vsel %vm286_vm1, %v384_v52, 0 }
 0x2d4   :  { %3154 = vmatpush3.bf16.xpose.msra.mxu1 %v389_v53 }
 0x2d5   :  { %3159 = vmatprep.subr.bf16.mxu1 %v3830_v0 }
 0x2d6   :  { %v433_v54 = vpop.permute.xlu1 %432 }
 0x2d7   :  { %v438_v56 = vsel %vm286_vm1, %v433_v54, 0 }
 0x2d8   :  { %v531_v58 = vpop.permute.xlu0 %530 }
 0x2d9   :  { %v536_v61 = vsel %vm286_vm1, %v531_v58, 0 }
 0x2da   :  { %v482_v55 = vpop.permute.xlu1 %481 }
 0x2db   :  { %v487_v57 = vsel %vm286_vm1, %v482_v55, 0  ;;  %3156 = vmatmul.mubr.msk.bf16.vlgmr.msra.gmra.mrb[8].mxu1 %vm286_vm1, %v4004_v35 }
 0x2dc   :  { %3160 = vmatpush3.bf16.xpose.msra.mxu1 %v438_v56  ;;  %3166 = vmatpush3.bf16.xpose.msra.mxu0 %v487_v57  ;;  %v629_v60 = vpop.permute.xlu0 %628 }
 0x2dd   :  { %3161 = vmatprep.mubr.msk.bf16.mxu1 %vm3831_vm0, %v3830_v0  ;;  %3171 = vmatprep.subr.bf16.mxu1 %v3830_v0  ;;  %v634_v1 = vsel %vm286_vm1, %v629_v60, 0  ;;  %v4120_v60 = vld [vmem:[#allocation5 + $0x38] sm:$0xff] }
 0x2de   :  { %3177 = vmatprep.subr.bf16.mxu0 %v3830_v0  ;;  %v580_v59 = vpop.permute.xlu1 %579 }
 0x2df   :  { %v585_v62 = vsel %vm286_vm1, %v580_v59, 0 }
 0x2e0   :  { %v773_v63 = vpop.permute.xlu0 %772 }
 0x2e1   :  { %v779_v2 = vsel %vm777_vm2, %v773_v63, 0 }
 0x2e2   :  { %v822_v3 = vpop.permute.xlu1 %821 }
 0x2e3   :  { %3162 = vmatmul.mubr.msk.bf16.vlgmr.msra.gmra.mrb[12].mxu1 %vm286_vm1, %v4008_v40  ;;  %3168 = vmatmul.mubr.msk.bf16.vlgmr.msra.gmra.mrb[4].mxu0 %vm286_vm1, %v4014_v43  ;;  %v827_v4 = vsel %vm777_vm2, %v822_v3, 0 }
 0x2e4   :  { %3172 = vmatpush3.bf16.xpose.msra.mxu1 %v536_v61  ;;  %3178 = vmatpush3.bf16.xpose.msra.mxu0 %v585_v62 }
 0x2e5   :  { %3173 = vmatprep.mubr.msk.bf16.mxu1 %vm3831_vm0, %v3830_v0  ;;  %3179 = vmatprep.mubr.msk.bf16.mxu0 %vm3831_vm0, %v3830_v0 }
 0x2e6   :  { %3183 = vmatprep.subr.bf16.mxu1 %v3830_v0  ;;  %3189 = vmatprep.subr.bf16.mxu0 %v3830_v0 }
 0x2eb   :  { %3174 = vmatmul.mubr.msk.bf16.vlgmr.msra.gmra.mrb[16].mxu1 %vm286_vm1, %v4010_v41  ;;  %3180 = vmatmul.mubr.msk.bf16.vlgmr.msra.gmra.mrb[8].mxu0 %vm286_vm1, %v4022_v48 }
 0x2ec   :  { %3184 = vmatpush3.bf16.xpose.msra.mxu1 %v634_v1  ;;  %3190 = vmatpush3.bf16.msra.mxu0 %v779_v2 }
 0x2ed   :  { %3185 = vmatprep.mubr.msk.bf16.mxu1 %vm3831_vm0, %v3830_v0  ;;  %3195 = vmatprep.subr.bf16.mxu1 %v3830_v0 }
 0x2ee   :  { %3191 = vmatprep.mubr.msk.bf16.mxu0 %vm3831_vm0, %v3830_v0  ;;  %3201 = vmatprep.subr.bf16.mxu0 %v3830_v0 }
 0x2f3   :  { %3186 = vmatmul.mubr.msk.bf16.vlgmr.msra.gmra.mrb[20].mxu1 %vm286_vm1, %v4018_v46 }
 0x2f4   :  { %3196 = vmatpush3.bf16.msra.mxu1 %v827_v4  ;;  %3197 = vmatprep.mubr.msk.bf16.mxu1 %vm3831_vm0, %v3830_v0 }
 0x2f5   :  { %3207 = vmatprep.subr.bf16.mxu1 %v3830_v0 }
 0x345   :  { %v327_v6 = vpop.f32.mrb[0].mxu1 }
 0x346   :  { %v4083_v7 = vadd.f32 %v327_v6, %v4080_v5  ;;  %v3145_v8 = vpop.f32.mrb[1].mxu1 }
 0x347   :  { %v330_v9 = vpop.f32.mrb[2].mxu1 }
 0x348   :  { %v3146_v10 = vpop.f32.mrb[3].mxu1  ;;  %v676_v11 = vsel %vm286_vm1, %v4083_v7, -inf }
 0x349   :  { %677 = vmax.xlane.f32.xlu1 %v676_v11 }
 0x34d   :  { %v376_v13 = vpop.f32.mrb[4].mxu1 }
 0x34e   :  { %v377_v14 = vadd.f32 %v376_v13, %v4087_v12  ;;  %v3151_v15 = vpop.f32.mrb[5].mxu1 }
 0x34f   :  { %v379_v16 = vpop.f32.mrb[6].mxu1 }
 0x350   :  { %v3152_v17 = vpop.f32.mrb[7].mxu1  ;;  %v679_v18 = vsel %vm286_vm1, %v377_v14, -inf }
 0x351   :  { %680 = vmax.xlane.f32.xlu0 %v679_v18 }
 0x3ae   :  { %v425_v20 = vpop.f32.mrb[8].mxu1 }
 0x3af   :  { %v4094_v21 = vadd.f32 %v425_v20, %v4091_v19  ;;  %v3157_v22 = vpop.f32.mrb[9].mxu1 }
 0x3b0   :  { %v428_v23 = vpop.f32.mrb[10].mxu1 }
 0x3b1   :  { %v3158_v24 = vpop.f32.mrb[11].mxu1  ;;  %v682_v25 = vsel %vm286_vm1, %v4094_v21, -inf }
 0x3b2   :  { %683 = vmax.xlane.f32.xlu0 %v682_v25 }
 0x3b6   :  { %v474_v28 = vpop.f32.mrb[12].mxu1  ;;  %v523_v29 = vpop.f32.mrb[4].mxu0 }
 0x3b7   :  { %v475_v30 = vadd.f32 %v474_v28, %v4098_v26  ;;  %v4104_v31 = vadd.f32 %v523_v29, %v4100_v27  ;;  %v3163_v32 = vpop.f32.mrb[13].mxu1  ;;  %v3169_v33 = vpop.f32.mrb[5].mxu0 }
 0x3b8   :  { %v477_v34 = vpop.f32.mrb[14].mxu1  ;;  %v526_v36 = vpop.f32.mrb[6].mxu0 }
 0x3b9   :  { %v3164_v37 = vpop.f32.mrb[15].mxu1  ;;  %v3170_v38 = vpop.f32.mrb[7].mxu0  ;;  %v685_v39 = vsel %vm286_vm1, %v475_v30, -inf  ;;  %v688_v42 = vsel %vm286_vm1, %v4104_v31, -inf }
 0x3ba   :  { %686 = vmax.xlane.f32.xlu1 %v685_v39  ;;  %689 = vmax.xlane.f32.xlu0 %v688_v42 }
 0x3be   :  { %v572_v47 = vpop.f32.mrb[16].mxu1  ;;  %v621_v49 = vpop.f32.mrb[8].mxu0 }
 0x3bf   :  { %v573_v50 = vadd.f32 %v572_v47, %v4109_v44  ;;  %v4115_v51 = vadd.f32 %v621_v49, %v4111_v45  ;;  %v3175_v52 = vpop.f32.mrb[17].mxu1  ;;  %v3181_v53 = vpop.f32.mrb[9].mxu0 }
 0x3c0   :  { %v575_v54 = vpop.f32.mrb[18].mxu1  ;;  %v624_v55 = vpop.f32.mrb[10].mxu0 }
 0x3c1   :  { %v3176_v56 = vpop.f32.mrb[19].mxu1  ;;  %v3182_v57 = vpop.f32.mrb[11].mxu0  ;;  %v691_v58 = vsel %vm286_vm1, %v573_v50, -inf  ;;  %v694_v59 = vsel %vm286_vm1, %v4115_v51, -inf }
 0x3c2   :  { %692 = vmax.xlane.f32.xlu1 %v691_v58  ;;  %695 = vmax.xlane.f32.xlu0 %v694_v59 }
 0x3c6   :  { %v670_v61 = vpop.f32.mrb[20].mxu1 }
 0x3c7   :  { %v671_v62 = vadd.f32 %v670_v61, %v4120_v60  ;;  %v3187_v63 = vpop.f32.mrb[21].mxu1 }
 0x3c8   :  { %v673_v1 = vpop.f32.mrb[22].mxu1 }
 0x3c9   :  { %v3188_v2 = vpop.f32.mrb[23].mxu1  ;;  %v697_v3 = vsel %vm286_vm1, %v671_v62, -inf }
 0x3ca   :  { %698 = vmax.xlane.f32.xlu1 %v697_v3 }
 0x3d6   :  { %v678_v4 = vpop.xlane.xlu1 %677 }
 0x3d7   :  { %v700_v6 = vsub.f32 %v4083_v7, %v678_v4 }
 0x3d8   :  { %917 = vrot.lane.b32.xlu0 %v4008_v40, %s3825_s10 }
 0x3d9   :  { %v708_v8 = vmul.f32 1.442695, %v700_v6 }
 0x3db   :  { %869 = vrot.lane.b32.xlu1 %v4004_v35, %s3825_s10  ;;  %3574 = vpow2.f32 %v708_v8 }
 0x3de   :  { %v681_v9 = vpop.xlane.xlu0 %680 }
 0x3df   :  { %v701_v10 = vsub.f32 %v377_v14, %v681_v9 }
 0x3e1   :  { %v710_v11 = vmul.f32 1.442695, %v701_v10 }
 0x3e3   :  { %3576 = vpow2.f32 %v710_v11 }
 0x3e5   :  { %v3575_v13 = vpop.eup %3574 }
 0x3e6   :  { %v724_v15 = vsel %vm286_vm1, %v3575_v13, 0.0 }
 0x3ed   :  { %v4130_v16 = vpop.eup %3576 }
 0x3ee   :  { %v727_v40 = vsel %vm286_vm1, %v4130_v16, 0.0 }
 0x3f7   :  { %725 = vadd.xlane.f32.xlu0 %v724_v15 }
 0x3ff   :  { %728 = vadd.xlane.f32.xlu1 %v727_v40 }
 0x410   :  { %965 = vrot.lane.b32.xlu1 %v4014_v43, %s3825_s10 }
 0x43f   :  { %v684_v35 = vpop.xlane.xlu0 %683 }
 0x440   :  { %v702_v7 = vsub.f32 %v4094_v21, %v684_v35 }
 0x442   :  { %v712_v17 = vmul.f32 1.442695, %v702_v7 }
 0x444   :  { %3578 = vpow2.f32 %v712_v17 }
 0x447   :  { %v687_v14 = vpop.xlane.xlu1 %686  ;;  %v690_v38 = vpop.xlane.xlu0 %689 }
 0x448   :  { %v703_v18 = vsub.f32 %v475_v30, %v687_v14  ;;  %v704_v39 = vsub.f32 %v4104_v31, %v690_v38 }
 0x44a   :  { %v714_v20 = vmul.f32 1.442695, %v703_v18  ;;  %v716_v47 = vmul.f32 1.442695, %v704_v39 }
 0x44c   :  { %3580 = vpow2.f32 %v714_v20 }
 0x44e   :  { %v4137_v22 = vpop.eup %3578 }
 0x44f   :  { %v693_v23 = vpop.xlane.xlu1 %692  ;;  %v730_v24 = vsel %vm286_vm1, %v4137_v22, 0.0  ;;  %v696_v42 = vpop.xlane.xlu0 %695 }
 0x450   :  { %v705_v25 = vsub.f32 %v573_v50, %v693_v23  ;;  %731 = vadd.xlane.f32.xlu0 %v730_v24  ;;  %v706_v49 = vsub.f32 %v4115_v51, %v696_v42 }
 0x452   :  { %v718_v28 = vmul.f32 1.442695, %v705_v25  ;;  %v720_v50 = vmul.f32 1.442695, %v706_v49 }
 0x453   :  { %v918_v52 = vpop.permute.xlu0 %917 }
 0x454   :  { %3582 = vpow2.f32 %v718_v28  ;;  %v923_v1 = vsel %vm777_vm2, %v918_v52, 0 }
 0x456   :  { %v4141_v43 = vpop.eup %3580 }
 0x457   :  { %v699_v29 = vpop.xlane.xlu1 %698  ;;  %v733_v21 = vsel %vm286_vm1, %v4141_v43, 0.0 }
 0x458   :  { %v707_v32 = vsub.f32 %v671_v62, %v699_v29  ;;  %734 = vadd.xlane.f32.xlu1 %v733_v21 }
 0x45a   :  { %v722_v30 = vmul.f32 1.442695, %v707_v32 }
 0x45b   :  { %v870_v31 = vpop.permute.xlu1 %869 }
 0x45c   :  { %3584 = vpow2.f32 %v722_v30  ;;  %v875_v59 = vsel %vm777_vm2, %v870_v31, 0 }
 0x45d   :  { %3586 = vpow2.f32 %v716_v47 }
 0x45e   :  { %v4145_v33 = vpop.eup %3582  ;;  %3588 = vpow2.f32 %v720_v50 }
 0x45f   :  { %v739_v34 = vsel %vm286_vm1, %v4145_v33, 0.0 }
 0x460   :  { %740 = vadd.xlane.f32.xlu1 %v739_v34 }
 0x466   :  { %v4149_v36 = vpop.eup %3584  ;;  %1013 = vrot.lane.b32.xlu0 %v4010_v41, %s3825_s10 }
 0x467   :  { %v745_v37 = vsel %vm286_vm1, %v4149_v36, 0.0  ;;  %v4159_v53 = vpop.eup %3586 }
 0x468   :  { %746 = vadd.xlane.f32.xlu1 %v745_v37  ;;  %v736_v54 = vsel %vm286_vm1, %v4159_v53, 0.0  ;;  %v4163_v55 = vpop.eup %3588 }
 0x469   :  { %v742_v51 = vsel %vm286_vm1, %v4163_v55, 0.0 }
 0x479   :  { %1061 = vrot.lane.b32.xlu1 %v4022_v48, %s3825_s10 }
 0x484   :  { %v726_v41 = vpop.xlane.xlu0 %725 }
 0x485   :  { %3590 = vrcp.f32 %v726_v41  ;;  %737 = vadd.xlane.f32.xlu0 %v736_v54 }
 0x489   :  { %743 = vadd.xlane.f32.xlu0 %v742_v51 }
 0x48c   :  { %v729_v56 = vpop.xlane.xlu1 %728 }
 0x48d   :  { %3592 = vrcp.f32 %v729_v56 }
 0x48f   :  { %v3591_v48 = vpop.eup %3590 }
 0x490   :  { %v756_v57 = vmul.f32 %v3591_v48, %v3575_v13  ;;  %v966_v3 = vpop.permute.xlu1 %965 }
 0x491   :  { %v971_v10 = vsel %vm777_vm2, %v966_v3, 0 }
 0x492   :  { %v764_v58 = vpack.c.bf16 %v756_v57, %v756_v57 }
 0x494   :  { %3192 = vmatmul.mubr.msk.bf16.vlgmr.msra.gmra.mrb[12].mxu0 %vm286_vm1, %v764_v58 }
 0x495   :  { %3202 = vmatpush3.bf16.msra.mxu0 %v875_v59  ;;  %3203 = vmatprep.mubr.msk.bf16.mxu0 %vm3831_vm0, %v3830_v0 }
 0x496   :  { %3213 = vmatprep.subr.bf16.mxu0 %v3830_v0 }
 0x497   :  { %v3593_v61 = vpop.eup %3592 }
 0x498   :  { %v757_v62 = vmul.f32 %v3593_v61, %v4130_v16 }
 0x49a   :  { %v765_v63 = vpack.c.bf16 %v757_v62, %v757_v62 }
 0x49c   :  { %3198 = vmatmul.mubr.msk.bf16.vlgmr.msra.gmra.mrb[24].mxu1 %vm286_vm1, %v765_v63  ;;  %v3526_v63 = vld [vmem:[#allocation8] sm:$0xff]  }
 0x49d   :  { %3208 = vmatpush3.bf16.msra.mxu1 %v923_v1  ;;  %3209 = vmatprep.mubr.msk.bf16.mxu1 %vm3831_vm0, %v3830_v0 }
 0x49e   :  { %3219 = vmatprep.subr.bf16.mxu1 %v3830_v0 }
 0x49f   :  { %1109 = vrot.lane.b32.xlu0 %v4018_v46, %s3825_s10 }
 0x4dd   :  { %v732_v2 = vpop.xlane.xlu0 %731 }
 0x4de   :  { %3594 = vrcp.f32 %v732_v2 }
 0x4e1   :  { %v1014_v15 = vpop.permute.xlu0 %1013 }
 0x4e2   :  { %v1019_v40 = vsel %vm777_vm2, %v1014_v15, 0 }
 0x4e5   :  { %v735_v4 = vpop.xlane.xlu1 %734 }
 0x4e6   :  { %3596 = vrcp.f32 %v735_v4  ;;  %v3527_v4 = vld [vmem:[#allocation8 + $0x8] sm:$0xff]  }
 0x4e8   :  { %v3595_v6 = vpop.eup %3594 }
 0x4e9   :  { %v758_v8 = vmul.f32 %v3595_v6, %v4137_v22 }
 0x4eb   :  { %v766_v9 = vpack.c.bf16 %v758_v8, %v758_v8 }
 0x4ed   :  { %v741_v11 = vpop.xlane.xlu1 %740  ;;  %3204 = vmatmul.mubr.msk.bf16.vlgmr.msra.gmra.mrb[16].mxu0 %vm286_vm1, %v766_v9 }
 0x4ee   :  { %3598 = vrcp.f32 %v741_v11  ;;  %3214 = vmatpush3.bf16.msra.mxu0 %v971_v10  ;;  %3215 = vmatprep.mubr.msk.bf16.mxu0 %vm3831_vm0, %v3830_v0 }
 0x4ef   :  { %3225 = vmatprep.subr.bf16.mxu0 %v3830_v0 }
 0x4f0   :  { %v3597_v46 = vpop.eup %3596 }
 0x4f1   :  { %v759_v13 = vmul.f32 %v3597_v46, %v4141_v43 }
 0x4f3   :  { %v767_v16 = vpack.c.bf16 %v759_v13, %v759_v13 }
 0x4f5   :  { %3210 = vmatmul.mubr.msk.bf16.vlgmr.msra.gmra.mrb[28].mxu1 %vm286_vm1, %v767_v16  ;;  %v747_v14 = vpop.xlane.xlu1 %746 }
 0x4f6   :  { %3220 = vmatpush3.bf16.msra.mxu1 %v1019_v40  ;;  %3221 = vmatprep.mubr.msk.bf16.mxu1 %vm3831_vm0, %v3830_v0  ;;  %3600 = vrcp.f32 %v747_v14 }
 0x4f7   :  { %3231 = vmatprep.subr.bf16.mxu1 %v3830_v0 }
 0x4f8   :  { %v3599_v35 = vpop.eup %3598 }
 0x4f9   :  { %v761_v7 = vmul.f32 %v3599_v35, %v4145_v33  ;;  %v1062_v21 = vpop.permute.xlu1 %1061 }
 0x4fa   :  { %v1067_v33 = vsel %vm777_vm2, %v1062_v21, 0 }
 0x4fb   :  { %v769_v17 = vpack.c.bf16 %v761_v7, %v761_v7 }
 0x4fd   :  { %3222 = vmatmul.mubr.msk.bf16.vlgmr.msra.gmra.mrb[32].mxu1 %vm286_vm1, %v769_v17 }
 0x4fe   :  { %3233 = vmatprep.mubr.msk.bf16.mxu1 %vm3831_vm0, %v3830_v0 }
 0x500   :  { %v3601_v20 = vpop.eup %3600 }
 0x501   :  { %v763_v23 = vmul.f32 %v3601_v20, %v4149_v36 }
 0x503   :  { %v771_v43 = vpack.c.bf16 %v763_v23, %v763_v23 }
 0x512   :  { %v738_v18 = vpop.xlane.xlu0 %737 }
 0x513   :  { %3602 = vrcp.f32 %v738_v18 }
 0x516   :  { %v744_v22 = vpop.xlane.xlu0 %743 }
 0x517   :  { %3604 = vrcp.f32 %v744_v22 }
 0x51a   :  { %v1110_v24 = vpop.permute.xlu0 %1109 }
 0x51b   :  { %v1115_v25 = vsel %vm777_vm2, %v1110_v24, 0 }
 0x51c   :  { %3232 = vmatpush3.bf16.msra.mxu1 %v1115_v25 }
 0x51d   :  { %v3603_v28 = vpop.eup %3602  ;;  %3245 = vmatprep.subr.bf16.mxu1 %v3830_v0 }
 0x51e   :  { %v760_v29 = vmul.f32 %v3603_v28, %v4159_v53 }
 0x51f   :  { %3234 = vmatmul.mubr.msk.bf16.vlgmr.msra.gmra.mrb[36].mxu1 %vm286_vm1, %v771_v43 }
 0x520   :  { %v768_v32 = vpack.c.bf16 %v760_v29, %v760_v29  ;;  %3261 = vmatprep.mubr.msk.bf16.mxu1 %vm3831_vm0, %v3830_v0 }
 0x521   :  { %v3605_v30 = vpop.eup %3604 }
 0x522   :  { %3216 = vmatmul.mubr.msk.bf16.vlgmr.msra.gmra.mrb[20].mxu0 %vm286_vm1, %v768_v32  ;;  %v762_v34 = vmul.f32 %v3605_v30, %v4163_v55 }
 0x523   :  { %3226 = vmatpush3.bf16.msra.mxu0 %v1067_v33  ;;  %3227 = vmatprep.mubr.msk.bf16.mxu0 %vm3831_vm0, %v3830_v0 }
 0x524   :  { %3237 = vmatprep.subr.bf16.mxu0 %v3830_v0  ;;  %v770_v36 = vpack.c.bf16 %v762_v34, %v762_v34  ;;  %v3528_v34 = vld [vmem:[#allocation10] sm:$0xff]  }
 0x525   :  { %3246 = vmatpush3.bf16.msra.mxu1 %v3528_v34 }
 0x526   :  { %3247 = vmatprep.subr.bf16.mxu1 %v3830_v0 }
 0x52a   :  { %3228 = vmatmul.mubr.msk.bf16.vlgmr.msra.gmra.mrb[24].mxu0 %vm286_vm1, %v770_v36  ;;  %v3529_v36 = vld [vmem:[#allocation10 + $0x8] sm:$0xff]  }
 0x52b   :  { %3241 = vmatprep.mubr.msk.bf16.mxu0 %vm3831_vm0, %v3830_v0  ;;  %3238 = vmatpush3.bf16.msra.mxu0 %v3526_v63  ;;  %v3541_v63 = vld [vmem:[#allocation11 + $0x28] sm:$0xff]  }
 0x52c   :  { %3239 = vmatprep.subr.bf16.mxu0 %v3830_v0  ;;  %3248 = vmatpush3.bf16.msra.mxu1 %v3529_v36 }
 0x52d   :  { %3249 = vmatprep.subr.bf16.mxu1 %v3830_v0 }
 0x52f   :  { %3240 = vmatpush3.bf16.msra.mxu0 %v3527_v4 }
 0x530   :  { %3265 = vmatprep.subr.bf16.mxu0 %v3830_v0 }
 0x567   :  { %v815_v37 = vpop.f32.mrb[12].mxu0 }
 0x568   :  { %v3193_v38 = vpop.f32.mrb[13].mxu0 }
 0x569   :  { %v818_v39 = vpop.f32.mrb[14].mxu0  ;;  %v3654_v38 = vld [vmem:[#allocation2] sm:$0xff] }
 0x56a   :  { %v3194_v42 = vpop.f32.mrb[15].mxu0 }
 0x56f   :  { %v863_v47 = vpop.f32.mrb[24].mxu1 }
 0x570   :  { %v3199_v49 = vpop.f32.mrb[25].mxu1 }
 0x571   :  { %v866_v50 = vpop.f32.mrb[26].mxu1  ;;  %v3655_v49 = vld [vmem:[#allocation2 + $0x8] sm:$0xff] }
 0x572   :  { %v3200_v52 = vpop.f32.mrb[27].mxu1 }
 0x5c0   :  { %v911_v53 = vpop.f32.mrb[16].mxu0 }
 0x5c1   :  { %v3205_v41 = vpop.f32.mrb[17].mxu0 }
 0x5c2   :  { %v914_v54 = vpop.f32.mrb[18].mxu0 }
 0x5c3   :  { %v3206_v55 = vpop.f32.mrb[19].mxu0  ;;  %v3530_v54 = vld [vmem:[#allocation10 + $0x10] sm:$0xff]  }
 0x5c4   :  { %3250 = vmatpush3.bf16.msra.mxu1 %v3530_v54  ;;  %v3531_v55 = vld [vmem:[#allocation10 + $0x18] sm:$0xff]  }
 0x5c5   :  { %3251 = vmatprep.subr.bf16.mxu1 %v3830_v0 }
 0x5c8   :  { %v959_v31 = vpop.f32.mrb[28].mxu1  ;;  %3252 = vmatpush3.bf16.msra.mxu1 %v3531_v55 }
 0x5c9   :  { %v3478_v51 = vpack.i.bf16 %v959_v31, %v911_v53  ;;  %v3211_v56 = vpop.f32.mrb[29].mxu1  ;;  %3253 = vmatprep.subr.bf16.mxu1 %v3830_v0  ;;  %v3532_v31 = vld [vmem:[#allocation10 + $0x20] sm:$0xff]  }
 0x5ca   :  { %v962_v48 = vpop.f32.mrb[30].mxu1  ;;  %v3534_v56 = vld [vmem:[#allocation10 + $0x30] sm:$0xff]  }
 0x5cb   :  { %v3212_v57 = vpop.f32.mrb[31].mxu1  ;;  %3479 = vrot.lane.b32.xlu1 %v3478_v51, %s3822_s20  ;;  %v3533_v51 = vld [vmem:[#allocation10 + $0x28] sm:$0xff]   ;;  %v3535_v48 = vld [vmem:[#allocation10 + $0x38] sm:$0xff]  }
 0x5cc   :  { %3254 = vmatpush3.bf16.msra.mxu1 %v3532_v31  ;;  %v3536_v57 = vld [vmem:[#allocation11] sm:$0xff]  }
 0x5cd   :  { %3255 = vmatprep.subr.bf16.mxu1 %v3830_v0 }
 0x5d0   :  { %v1055_v58 = vpop.f32.mrb[32].mxu1  ;;  %3256 = vmatpush3.bf16.msra.mxu1 %v3533_v51 }
 0x5d1   :  { %v3223_v59 = vpop.f32.mrb[33].mxu1  ;;  %3257 = vmatprep.subr.bf16.mxu1 %v3830_v0 }
 0x5d2   :  { %v1058_v61 = vpop.f32.mrb[34].mxu1  ;;  %v3538_v59 = vld [vmem:[#allocation11 + $0x10] sm:$0xff]  }
 0x5d3   :  { %v3224_v62 = vpop.f32.mrb[35].mxu1  ;;  %v3539_v61 = vld [vmem:[#allocation11 + $0x18] sm:$0xff]  }
 0x5d4   :  { %3258 = vmatpush3.bf16.msra.mxu1 %v3534_v56  ;;  %v3540_v62 = vld [vmem:[#allocation11 + $0x20] sm:$0xff]  }
 0x5d5   :  { %3259 = vmatprep.subr.bf16.mxu1 %v3830_v0 }
 0x5d8   :  { %3260 = vmatpush3.bf16.msra.mxu1 %v3535_v48  ;;  %v2950_v48 = vld [vmem:[%s4544_s2 + $0x1] ss:$0 sm:$0xff] }
 0x5d9   :  { %3285 = vmatprep.subr.bf16.mxu1 %v3830_v0 }
 0x5f2   :  { %v1151_v1 = vpop.f32.mrb[36].mxu1 }
 0x5f3   :  { %v3235_v2 = vpop.f32.mrb[37].mxu1 }
 0x5f4   :  { %v1154_v3 = vpop.f32.mrb[38].mxu1 }
 0x5f5   :  { %v1007_v6 = vpop.f32.mrb[20].mxu0  ;;  %v3236_v8 = vpop.f32.mrb[39].mxu1 }
 0x5f6   :  { %v3483_v9 = vpack.i.bf16 %v1055_v58, %v1007_v6  ;;  %v3217_v10 = vpop.f32.mrb[21].mxu0  ;;  %v3537_v58 = vld [vmem:[#allocation11 + $0x8] sm:$0xff]  }
 0x5f7   :  { %v1010_v11 = vpop.f32.mrb[22].mxu0 }
 0x5f8   :  { %3484 = vrot.lane.b32.xlu0 %v3483_v9, %s3836_s6  ;;  %v3218_v46 = vpop.f32.mrb[23].mxu0 }
 0x5f9   :  { %v2932_v46 = vld [vmem:[%s4545_s3] ss:$0 sm:$0xff] }
 0x5fd   :  { %v1103_v13 = vpop.f32.mrb[24].mxu0 }
 0x5fe   :  { %v3488_v15 = vpack.i.bf16 %v1151_v1, %v1103_v13  ;;  %v3229_v16 = vpop.f32.mrb[25].mxu0 }
 0x5ff   :  { %v1106_v40 = vpop.f32.mrb[26].mxu0 }
 0x600   :  { %3489 = vrot.lane.b32.xlu1 %v3488_v15, %s3837_s24  ;;  %v3230_v35 = vpop.f32.mrb[27].mxu0 }
 0x601   :  { %v3542_v35 = vld [vmem:[#allocation11 + $0x30] sm:$0xff]  }
 0x63d   :  { %v3480_v7 = vpop.permute.xlu1 %3479 }
 0x63e   :  { %v3482_v14 = vunpack.i.h.bf16 %v3480_v7  ;;  %v3481_v18 = vunpack.i.l.bf16 %v3480_v7  ;;  %v3543_v7 = vld [vmem:[#allocation11 + $0x38] sm:$0xff]  }
 0x640   :  { %v1182_v24 = vsel %vm286_vm1, %v863_v47, %v3482_v14  ;;  %v1181_v25 = vsel %vm286_vm1, %v815_v37, %v3481_v18 }
 0x66a   :  { %v3485_v17 = vpop.permute.xlu0 %3484 }
 0x66b   :  { %v3487_v20 = vunpack.i.h.bf16 %v3485_v17  ;;  %v3486_v22 = vunpack.i.l.bf16 %v3485_v17 }
 0x66d   :  { %v1185_v29 = vsel %vm1183_vm3, %v1182_v24, %v3487_v20  ;;  %v1184_v21 = vsel %vm1183_vm3, %v1181_v25, %v3486_v22  ;;  %v3544_v25 = vld [vmem:[#allocation7 + $0x40] sm:$0xff]  }
 0x672   :  { %v3490_v23 = vpop.permute.xlu1 %3489 }
 0x673   :  { %v3492_v28 = vunpack.i.h.bf16 %v3490_v23  ;;  %v3491_v43 = vunpack.i.l.bf16 %v3490_v23 }
 0x675   :  { %v1188_v32 = vsel %vm1186_vm4, %v1185_v29, %v3492_v28  ;;  %v1187_v30 = vsel %vm1186_vm4, %v1184_v21, %v3491_v43  ;;  %v3545_v28 = vld [vmem:[#allocation7 + $0x48] sm:$0xff]  }
 0x676   :  { %v1189_v33 = vpack.c.bf16 %v1188_v32, %v1187_v30 }
 0x678   :  { %3242 = vmatmul.mubr.msk.bf16.vlgmr.msra.gmra.mrb[28].mxu0 %vm1206_vm5, %v1189_v33 }
 0x679   :  { %3281 = vmatprep.mubr.msk.bf16.mxu0 %vm3831_vm0, %v3830_v0  ;;  %3266 = vmatpush3.bf16.msra.mxu0 %v3536_v57 }
 0x67a   :  { %3267 = vmatprep.subr.bf16.mxu0 %v3830_v0 }
 0x67d   :  { %3268 = vmatpush3.bf16.msra.mxu0 %v3537_v58 }
 0x67e   :  { %3269 = vmatprep.subr.bf16.mxu0 %v3830_v0 }
 0x681   :  { %3270 = vmatpush3.bf16.msra.mxu0 %v3538_v59 }
 0x682   :  { %3271 = vmatprep.subr.bf16.mxu0 %v3830_v0 }
 0x685   :  { %3272 = vmatpush3.bf16.msra.mxu0 %v3539_v61 }
 0x686   :  { %3273 = vmatprep.subr.bf16.mxu0 %v3830_v0 }
 0x689   :  { %3274 = vmatpush3.bf16.msra.mxu0 %v3540_v62 }
 0x68a   :  { %3275 = vmatprep.subr.bf16.mxu0 %v3830_v0 }
 0x68d   :  { %3276 = vmatpush3.bf16.msra.mxu0 %v3541_v63 }
 0x68e   :  { %3277 = vmatprep.subr.bf16.mxu0 %v3830_v0 }
 0x691   :  { %3278 = vmatpush3.bf16.msra.mxu0 %v3542_v35 }
 0x692   :  { %3279 = vmatprep.subr.bf16.mxu0 %v3830_v0 }
 0x695   :  { %3280 = vmatpush3.bf16.msra.mxu0 %v3543_v7 }
 0x696   :  { %3305 = vmatprep.subr.bf16.mxu0 %v3830_v0 }
 0x74b   :  { %v1244_v37 = vpop.f32.mrb[28].mxu0 }
 0x74c   :  { %v4228_v39 = vadd.f32 %v3654_v38, %v1244_v37  ;;  %v3243_v42 = vpop.f32.mrb[29].mxu0  ;;  %v3546_v37 = vld [vmem:[#allocation7 + $0x50] sm:$0xff]   ;;  %v3547_v38 = vld [vmem:[#allocation7 + $0x58] sm:$0xff]  }
 0x74d   :  { %v1247_v47 = vpop.f32.mrb[30].mxu0  ;;  %v3549_v42 = vld [vmem:[#allocation7 + $0x68] sm:$0xff]  }
 0x74e   :  { %v4230_v50 = vadd.f32 %v3655_v49, %v1247_v47  ;;  %v3244_v52 = vpop.f32.mrb[31].mxu0  ;;  %v1254_v53 = vmul.f32 %v4228_v39, %v4228_v39  ;;  %v3550_v47 = vld [vmem:[#allocation7 + $0x70] sm:$0xff]   ;;  %v3551_v49 = vld [vmem:[#allocation7 + $0x78] sm:$0xff]  }
 0x750   :  { %1256 = vadd.xlane.f32.xlu0 %v1254_v53  ;;  %v1255_v41 = vmul.f32 %v4230_v50, %v4230_v50 }
 0x752   :  { %1258 = vadd.xlane.f32.xlu1 %v1255_v41 }
 0x7dd   :  { %v1257_v1 = vpop.xlane.xlu0 %1256 }
 0x7de   :  { %v1260_v2 = vmul.f32 0.03125, %v1257_v1 }
 0x7df   :  { %v1259_v3 = vpop.xlane.xlu1 %1258 }
 0x7e0   :  { %v1262_v4 = vadd.f32 1e-06, %v1260_v2  ;;  %v1261_v6 = vmul.f32 0.03125, %v1259_v3 }
 0x7e2   :  { %3606 = vrsqrt.f32 %v1262_v4  ;;  %v1263_v8 = vadd.f32 1e-06, %v1261_v6 }
 0x7e4   :  { %3608 = vrsqrt.f32 %v1263_v8 }
 0x7ec   :  { %v3607_v9 = vpop.eup %3606 }
 0x7ed   :  { %v1266_v10 = vmul.f32 %v3607_v9, %v4228_v39 }
 0x7ee   :  { %v3609_v11 = vpop.eup %3608 }
 0x7ef   :  { %v1267_v13 = vmul.f32 %v3609_v11, %v4230_v50  ;;  %v1274_v15 = vmul.f32 %v2932_v46, %v1266_v10 }
 0x7f1   :  { %v1275_v16 = vmul.f32 %v2932_v46, %v1267_v13 }
 0x7f3   :  { %v1276_v40 = vpack.c.bf16 %v1275_v16, %v1274_v15 }
 0x7f5   :  { %3262 = vmatmul.mubr.bf16.vlgmr.msra.gmra.mrb[40].mxu1 %v1276_v40 }
 0x7f6   :  { %3301 = vmatprep.mubr.msk.bf16.mxu1 %vm3831_vm0, %v3830_v0  ;;  %3286 = vmatpush3.bf16.msra.mxu1 %v3544_v25 }
 0x7f7   :  { %3287 = vmatprep.subr.bf16.mxu1 %v3830_v0 }
 0x7fa   :  { %3288 = vmatpush3.bf16.msra.mxu1 %v3545_v28 }
 0x7fb   :  { %3289 = vmatprep.subr.bf16.mxu1 %v3830_v0 }
 0x7fe   :  { %3290 = vmatpush3.bf16.msra.mxu1 %v3546_v37 }
 0x7ff   :  { %3291 = vmatprep.subr.bf16.mxu1 %v3830_v0 }
 0x802   :  { %3292 = vmatpush3.bf16.msra.mxu1 %v3547_v38 }
 0x803   :  { %3293 = vmatprep.subr.bf16.mxu1 %v3830_v0 }
 0x8c8   :  { %v1375_v17 = vpop.f32.mrb[40].mxu1 }
 0x8c9   :  { %v3263_v14 = vpop.f32.mrb[41].mxu1  ;;  %v1382_v20 = vmax.f32 %v1375_v17, 0.0 }
 0x8ca   :  { %v1378_v18 = vpop.f32.mrb[42].mxu1 }
 0x8cb   :  { %v1383_v22 = vmax.f32 %v1378_v18, 0.0  ;;  %v3264_v23 = vpop.f32.mrb[43].mxu1 }
 0x8cd   :  { %v1384_v24 = vpack.c.bf16 %v1383_v22, %v1382_v20 }
 0x8cf   :  { %3282 = vmatmul.mubr.bf16.vlgmr.msra.gmra.mrb[32].mxu0 %v1384_v24 }
 0x8d0   :  { %3307 = vmatprep.mubr.msk.bf16.mxu0 %vm3831_vm0, %v3830_v0 }
 0x9a2   :  { %v1483_v43 = vpop.f32.mrb[32].mxu0 }
 0x9a3   :  { %v4262_v29 = vadd.f32 %v1483_v43, %v4228_v39  ;;  %v3283_v21 = vpop.f32.mrb[33].mxu0  ;;  %v3548_v39 = vld [vmem:[#allocation7 + $0x60] sm:$0xff]  }
 0x9a4   :  { %v1486_v32 = vpop.f32.mrb[34].mxu0  ;;  %3294 = vmatpush3.bf16.msra.mxu1 %v3548_v39 }
 0x9a5   :  { %v4265_v30 = vadd.f32 %v1486_v32, %v4230_v50  ;;  %v3284_v33 = vpop.f32.mrb[35].mxu0  ;;  %v1494_v34 = vmul.f32 %v4262_v29, %v4262_v29  ;;  %3295 = vmatprep.subr.bf16.mxu1 %v3830_v0 }
 0x9a7   :  { %1496 = vadd.xlane.f32.xlu0 %v1494_v34  ;;  %v1495_v36 = vmul.f32 %v4265_v30, %v4265_v30 }
 0x9a8   :  { %3296 = vmatpush3.bf16.msra.mxu1 %v3549_v42 }
 0x9a9   :  { %3297 = vmatprep.subr.bf16.mxu1 %v3830_v0 }
 0x9ab   :  { %1498 = vadd.xlane.f32.xlu0 %v1495_v36 }
 0x9ac   :  { %3298 = vmatpush3.bf16.msra.mxu1 %v3550_v47 }
 0x9ad   :  { %3299 = vmatprep.subr.bf16.mxu1 %v3830_v0 }
 0x9b0   :  { %3300 = vmatpush3.bf16.msra.mxu1 %v3551_v49 }
 0x9b1   :  { %3329 = vmatprep.subr.bf16.mxu1 %v3830_v0 }
 0xa34   :  { %v1497_v50 = vpop.xlane.xlu0 %1496 }
 0xa35   :  { %v1500_v52 = vmul.f32 0.03125, %v1497_v50 }
 0xa37   :  { %v1502_v53 = vadd.f32 1e-06, %v1500_v52 }
 0xa38   :  { %v1499_v41 = vpop.xlane.xlu0 %1498 }
 0xa39   :  { %3610 = vrsqrt.f32 %v1502_v53  ;;  %v1501_v54 = vmul.f32 0.03125, %v1499_v41 }
 0xa3b   :  { %v1503_v55 = vadd.f32 1e-06, %v1501_v54 }
 0xa3d   :  { %3612 = vrsqrt.f32 %v1503_v55 }
 0xa43   :  { %v3611_v31 = vpop.eup %3610 }
 0xa44   :  { %v1506_v51 = vmul.f32 %v3611_v31, %v4262_v29 }
 0xa46   :  { %v1514_v58 = vmul.f32 %v2950_v48, %v1506_v51 }
 0xa47   :  { %v3613_v56 = vpop.eup %3612 }
 0xa48   :  { %v1507_v57 = vmul.f32 %v3613_v56, %v4265_v30 }
 0xa4a   :  { %v1515_v59 = vmul.f32 %v2950_v48, %v1507_v57 }
 0xa4c   :  { %v1516_v61 = vpack.c.bf16 %v1515_v59, %v1514_v58 }
 0xa4e   :  { %3302 = vmatmul.mubr.bf16.vlgmr.msra.gmra.mrb[44].mxu1 %v1516_v61 }
 0xa4f   :  { %3331 = vmatprep.mubr.msk.bf16.mxu1 %vm3831_vm0, %v3830_v0 }
 0xb21   :  { %v1616_v62 = vpop.f32.mrb[44].mxu1 }
 0xb22   :  { %1625 = vrot.lane.b32.xlu1 %v1616_v62, %s3832_s23  ;;  %v3303_v63 = vpop.f32.mrb[45].mxu1  ;;  %v1643_v4 = vpack.c.bf16 %v1616_v62, %v1616_v62 }
 0xb23   :  { %v1619_v1 = vpop.f32.mrb[46].mxu1 }
 0xb24   :  { %1627 = vrot.lane.b32.xlu0 %v1619_v1, %s3832_s23  ;;  %v3304_v2 = vpop.f32.mrb[47].mxu1  ;;  %v3493_v3 = vpack.i.bf16 %v1619_v1, %v1616_v62  ;;  %v4289_v6 = vpack.c.bf16 %v1619_v1, %v1619_v1 }
 0xb26   :  { %3494 = vrot.lane.b32.xlu1 %v3493_v3, %s3833_s25 }
 0xb28   :  { %1652 = vrot.lane.b32.xlu0 %v1643_v4, %s3835_s28 }
 0xb2a   :  { %3499 = vrot.lane.b32.xlu1 %v3493_v3, %s3834_s27 }
 0xb2e   :  { %1701 = vrot.lane.b32.xlu1 %v4289_v6, %s3835_s28 }
 0xb94   :  { %v1626_v8 = vpop.permute.xlu1 %1625 }
 0xb95   :  { %v4293_v9 = vpack.c.bf16 %v1626_v8, %v1626_v8 }
 0xb96   :  { %v1628_v10 = vpop.permute.xlu0 %1627 }
 0xb97   :  { %v4295_v11 = vpack.c.bf16 %v1628_v10, %v1628_v10  ;;  %1750 = vrot.lane.b32.xlu0 %v4293_v9, %s3835_s28 }
 0xb98   :  { %v3495_v46 = vpop.permute.xlu1 %3494 }
 0xb99   :  { %v3497_v13 = vunpack.i.h.bf16 %v3495_v46  ;;  %v3496_v15 = vunpack.i.l.bf16 %v3495_v46  ;;  %1799 = vrot.lane.b32.xlu1 %v4295_v11, %s3835_s28 }
 0xb9a   :  { %v1653_v16 = vpop.permute.xlu0 %1652 }
 0xb9b   :  { %v4301_v40 = vpack.c.bf16 %v3497_v13, %v3497_v13  ;;  %v4303_v35 = vpack.c.bf16 %v3496_v15, %v3496_v15  ;;  %v1658_v7 = vsel %vm286_vm1, %v1653_v16, 0 }
 0xb9c   :  { %v3500_v17 = vpop.permute.xlu1 %3499  ;;  %3306 = vmatpush3.bf16.xpose.msra.mxu0 %v1658_v7 }
 0xb9d   :  { %v3502_v14 = vunpack.i.h.bf16 %v3500_v17  ;;  %v3501_v18 = vunpack.i.l.bf16 %v3500_v17  ;;  %1848 = vrot.lane.b32.xlu0 %v4303_v35, %s3835_s28  ;;  %1897 = vrot.lane.b32.xlu1 %v4301_v40, %s3835_s28 }
 0xb9e   :  { %3311 = vmatprep.subr.bf16.mxu0 %v3830_v0 }
 0xb9f   :  { %v4311_v20 = vpack.c.bf16 %v3502_v14, %v3502_v14  ;;  %v4313_v22 = vpack.c.bf16 %v3501_v18, %v3501_v18 }
 0xba0   :  { %v1702_v23 = vpop.permute.xlu1 %1701 }
 0xba1   :  { %1946 = vrot.lane.b32.xlu0 %v4313_v22, %s3835_s28  ;;  %1995 = vrot.lane.b32.xlu1 %v4311_v20, %s3835_s28  ;;  %v1707_v24 = vsel %vm286_vm1, %v1702_v23, 0 }
 0xba3   :  { %3308 = vmatmul.mubr.msk.bf16.vlgmr.msra.gmra.mrb[36].mxu0 %vm286_vm1, %v1643_v4 }
 0xba4   :  { %3312 = vmatpush3.bf16.xpose.msra.mxu0 %v1707_v24  ;;  %3313 = vmatprep.mubr.msk.bf16.mxu0 %vm3831_vm0, %v3830_v0 }
 0xba5   :  { %2139 = vrot.lane.b32.xlu1 %v1643_v4, %s3825_s10  ;;  %3317 = vmatprep.subr.bf16.mxu0 %v3830_v0 }
 0xbab   :  { %3314 = vmatmul.mubr.msk.bf16.vlgmr.msra.gmra.mrb[40].mxu0 %vm286_vm1, %v4289_v6 }
 0xbac   :  { %3319 = vmatprep.mubr.msk.bf16.mxu0 %vm3831_vm0, %v3830_v0 }
 0xc09   :  { %v1751_v25 = vpop.permute.xlu0 %1750 }
 0xc0a   :  { %v1756_v28 = vsel %vm286_vm1, %v1751_v25, 0 }
 0xc0b   :  { %3318 = vmatpush3.bf16.xpose.msra.mxu0 %v1756_v28  ;;  %v1800_v43 = vpop.permute.xlu1 %1799 }
 0xc0c   :  { %3323 = vmatprep.subr.bf16.mxu0 %v3830_v0  ;;  %v1805_v34 = vsel %vm286_vm1, %v1800_v43, 0 }
 0xc0f   :  { %v1849_v21 = vpop.permute.xlu0 %1848  ;;  %v1898_v33 = vpop.permute.xlu1 %1897 }
 0xc10   :  { %v1854_v32 = vsel %vm286_vm1, %v1849_v21, 0  ;;  %v1903_v39 = vsel %vm286_vm1, %v1898_v33, 0 }
 0xc11   :  { %3330 = vmatpush3.bf16.xpose.msra.mxu1 %v1854_v32 }
 0xc12   :  { %3320 = vmatmul.mubr.msk.bf16.vlgmr.msra.gmra.mrb[44].mxu0 %vm286_vm1, %v4293_v9  ;;  %3341 = vmatprep.subr.bf16.mxu1 %v3830_v0 }
 0xc13   :  { %3324 = vmatpush3.bf16.xpose.msra.mxu0 %v1805_v34  ;;  %3325 = vmatprep.mubr.msk.bf16.mxu0 %vm3831_vm0, %v3830_v0  ;;  %v1947_v36 = vpop.permute.xlu0 %1946  ;;  %v1996_v37 = vpop.permute.xlu1 %1995 }
 0xc14   :  { %3335 = vmatprep.subr.bf16.mxu0 %v3830_v0  ;;  %v1952_v38 = vsel %vm286_vm1, %v1947_v36, 0  ;;  %v2001_v49 = vsel %vm286_vm1, %v1996_v37, 0 }
 0xc17   :  { %v2140_v42 = vpop.permute.xlu1 %2139 }
 0xc18   :  { %3332 = vmatmul.mubr.msk.bf16.vlgmr.msra.gmra.mrb[48].mxu1 %vm286_vm1, %v4303_v35  ;;  %v2145_v47 = vsel %vm777_vm2, %v2140_v42, 0 }
 0xc19   :  { %3342 = vmatpush3.bf16.xpose.msra.mxu1 %v1952_v38  ;;  %3343 = vmatprep.mubr.msk.bf16.mxu1 %vm3831_vm0, %v3830_v0 }
 0xc1a   :  { %3326 = vmatmul.mubr.msk.bf16.vlgmr.msra.gmra.mrb[48].mxu0 %vm286_vm1, %v4295_v11  ;;  %3353 = vmatprep.subr.bf16.mxu1 %v3830_v0 }
 0xc1b   :  { %3336 = vmatpush3.bf16.xpose.msra.mxu0 %v1903_v39  ;;  %3337 = vmatprep.mubr.msk.bf16.mxu0 %vm3831_vm0, %v3830_v0 }
 0xc1c   :  { %3347 = vmatprep.subr.bf16.mxu0 %v3830_v0 }
 0xc20   :  { %3344 = vmatmul.mubr.msk.bf16.vlgmr.msra.gmra.mrb[52].mxu1 %vm286_vm1, %v4313_v22 }
 0xc21   :  { %3354 = vmatpush3.bf16.msra.mxu1 %v2145_v47  ;;  %3355 = vmatprep.mubr.msk.bf16.mxu1 %vm3831_vm0, %v3830_v0 }
 0xc22   :  { %3338 = vmatmul.mubr.msk.bf16.vlgmr.msra.gmra.mrb[52].mxu0 %vm286_vm1, %v4301_v40  ;;  %3365 = vmatprep.subr.bf16.mxu1 %v3830_v0 }
 0xc23   :  { %3348 = vmatpush3.bf16.xpose.msra.mxu0 %v2001_v49  ;;  %3349 = vmatprep.mubr.msk.bf16.mxu0 %vm3831_vm0, %v3830_v0 }
 0xc24   :  { %3359 = vmatprep.subr.bf16.mxu0 %v3830_v0 }
 0xc2a   :  { %3350 = vmatmul.mubr.msk.bf16.vlgmr.msra.gmra.mrb[56].mxu0 %vm286_vm1, %v4311_v20 }
 0xc2b   :  { %3361 = vmatprep.mubr.msk.bf16.mxu0 %vm3831_vm0, %v3830_v0 }
 0xc76   :  { %v1694_v50 = vpop.f32.mrb[36].mxu0 }
 0xc77   :  { %v1695_v52 = vadd.f32 %v1694_v50, %v4080_v5  ;;  %v3309_v53 = vpop.f32.mrb[37].mxu0 }
 0xc78   :  { %v1697_v41 = vpop.f32.mrb[38].mxu0 }
 0xc79   :  { %v3310_v54 = vpop.f32.mrb[39].mxu0  ;;  %v2043_v55 = vsel %vm286_vm1, %v1695_v52, -inf }
 0xc7a   :  { %2044 = vmax.xlane.f32.xlu0 %v2043_v55 }
 0xc7e   :  { %v1743_v31 = vpop.f32.mrb[40].mxu0 }
 0xc7f   :  { %v1744_v51 = vadd.f32 %v1743_v31, %v4087_v12  ;;  %v3315_v56 = vpop.f32.mrb[41].mxu0 }
 0xc80   :  { %v1746_v48 = vpop.f32.mrb[42].mxu0 }
 0xc81   :  { %v3316_v57 = vpop.f32.mrb[43].mxu0  ;;  %v2046_v58 = vsel %vm286_vm1, %v1744_v51, -inf }
 0xc82   :  { %2047 = vmax.xlane.f32.xlu1 %v2046_v58 }
 0xce5   :  { %v1792_v59 = vpop.f32.mrb[44].mxu0 }
 0xce6   :  { %v1793_v61 = vadd.f32 %v1792_v59, %v4091_v19  ;;  %v3321_v62 = vpop.f32.mrb[45].mxu0 }
 0xce7   :  { %v1795_v5 = vpop.f32.mrb[46].mxu0 }
 0xce8   :  { %v3322_v63 = vpop.f32.mrb[47].mxu0  ;;  %v2049_v1 = vsel %vm286_vm1, %v1793_v61, -inf }
 0xce9   :  { %2050 = vmax.xlane.f32.xlu0 %v2049_v1 }
 0xceb   :  { %v1890_v2 = vpop.f32.mrb[48].mxu1 }
 0xcec   :  { %v1891_v3 = vadd.f32 %v1890_v2, %v4100_v27  ;;  %v3333_v4 = vpop.f32.mrb[49].mxu1 }
 0xced   :  { %v1841_v12 = vpop.f32.mrb[48].mxu0  ;;  %v1893_v8 = vpop.f32.mrb[50].mxu1 }
 0xcee   :  { %v1842_v10 = vadd.f32 %v1841_v12, %v4098_v26  ;;  %v3327_v46 = vpop.f32.mrb[49].mxu0  ;;  %v3334_v13 = vpop.f32.mrb[51].mxu1  ;;  %v2055_v15 = vsel %vm286_vm1, %v1891_v3, -inf }
 0xcef   :  { %2056 = vmax.xlane.f32.xlu1 %v2055_v15  ;;  %v1844_v19 = vpop.f32.mrb[50].mxu0 }
 0xcf0   :  { %v3328_v16 = vpop.f32.mrb[51].mxu0  ;;  %v2052_v7 = vsel %vm286_vm1, %v1842_v10, -inf }
 0xcf1   :  { %2053 = vmax.xlane.f32.xlu0 %v2052_v7 }
 0xcf3   :  { %v1988_v17 = vpop.f32.mrb[52].mxu1 }
 0xcf4   :  { %v4378_v14 = vadd.f32 %v1988_v17, %v4111_v45  ;;  %v3345_v27 = vpop.f32.mrb[53].mxu1 }
 0xcf5   :  { %v1939_v18 = vpop.f32.mrb[52].mxu0  ;;  %v1991_v23 = vpop.f32.mrb[54].mxu1 }
 0xcf6   :  { %v4381_v24 = vadd.f32 %v1939_v18, %v4109_v44  ;;  %v3339_v26 = vpop.f32.mrb[53].mxu0  ;;  %v3346_v25 = vpop.f32.mrb[55].mxu1  ;;  %v2061_v28 = vsel %vm286_vm1, %v4378_v14, -inf }
 0xcf7   :  { %2062 = vmax.xlane.f32.xlu1 %v2061_v28  ;;  %v1942_v43 = vpop.f32.mrb[54].mxu0 }
 0xcf8   :  { %v3340_v21 = vpop.f32.mrb[55].mxu0  ;;  %v2058_v32 = vsel %vm286_vm1, %v4381_v24, -inf }
 0xcf9   :  { %2059 = vmax.xlane.f32.xlu0 %v2058_v32 }
 0xcfd   :  { %v2037_v45 = vpop.f32.mrb[56].mxu0 }
 0xcfe   :  { %v2038_v33 = vadd.f32 %v2037_v45, %v4120_v60  ;;  %v3351_v34 = vpop.f32.mrb[57].mxu0 }
 0xcff   :  { %v2040_v36 = vpop.f32.mrb[58].mxu0 }
 0xd00   :  { %v3352_v37 = vpop.f32.mrb[59].mxu0  ;;  %v2064_v44 = vsel %vm286_vm1, %v2038_v33, -inf }
 0xd01   :  { %2065 = vmax.xlane.f32.xlu0 %v2064_v44 }
 0xd07   :  { %v2045_v38 = vpop.xlane.xlu0 %2044 }
 0xd08   :  { %2235 = vrot.lane.b32.xlu1 %v4293_v9, %s3825_s10  ;;  %v2067_v39 = vsub.f32 %v1695_v52, %v2045_v38 }
 0xd0a   :  { %v2075_v47 = vmul.f32 1.442695, %v2067_v39 }
 0xd0c   :  { %2283 = vrot.lane.b32.xlu1 %v4295_v11, %s3825_s10  ;;  %3614 = vpow2.f32 %v2075_v47 }
 0xd0f   :  { %v2048_v42 = vpop.xlane.xlu1 %2047 }
 0xd10   :  { %v2068_v60 = vsub.f32 %v1744_v51, %v2048_v42 }
 0xd12   :  { %v2077_v49 = vmul.f32 1.442695, %v2068_v60 }
 0xd14   :  { %3616 = vpow2.f32 %v2077_v49 }
 0xd16   :  { %v3615_v50 = vpop.eup %3614 }
 0xd17   :  { %2187 = vrot.lane.b32.xlu0 %v4289_v6, %s3825_s10  ;;  %v2091_v53 = vsel %vm286_vm1, %v3615_v50, 0.0 }
 0xd1e   :  { %v4396_v41 = vpop.eup %3616 }
 0xd1f   :  { %v2094_v9 = vsel %vm286_vm1, %v4396_v41, 0.0 }
 0xd30   :  { %2092 = vadd.xlane.f32.xlu1 %v2091_v53 }
 0xd36   :  { %2095 = vadd.xlane.f32.xlu0 %v2094_v9 }
 0xd76   :  { %v2051_v11 = vpop.xlane.xlu0 %2050 }
 0xd77   :  { %v2069_v54 = vsub.f32 %v1793_v61, %v2051_v11 }
 0xd79   :  { %v2079_v6 = vmul.f32 1.442695, %v2069_v54 }
 0xd7b   :  { %3618 = vpow2.f32 %v2079_v6 }
 0xd7c   :  { %v2057_v52 = vpop.xlane.xlu1 %2056 }
 0xd7d   :  { %v2071_v55 = vsub.f32 %v1891_v3, %v2057_v52 }
 0xd7e   :  { %v2054_v31 = vpop.xlane.xlu0 %2053 }
 0xd7f   :  { %v2083_v51 = vmul.f32 1.442695, %v2071_v55  ;;  %v2070_v56 = vsub.f32 %v1842_v10, %v2054_v31 }
 0xd81   :  { %3620 = vpow2.f32 %v2083_v51  ;;  %v2081_v48 = vmul.f32 1.442695, %v2070_v56 }
 0xd83   :  { %3622 = vpow2.f32 %v2081_v48 }
 0xd84   :  { %v2063_v4 = vpop.xlane.xlu1 %2062 }
 0xd85   :  { %v4400_v57 = vpop.eup %3618  ;;  %v2073_v12 = vsub.f32 %v4378_v14, %v2063_v4 }
 0xd86   :  { %v2097_v58 = vsel %vm286_vm1, %v4400_v57, 0.0  ;;  %v2060_v59 = vpop.xlane.xlu0 %2059 }
 0xd87   :  { %2098 = vadd.xlane.f32.xlu1 %v2097_v58  ;;  %v2072_v8 = vsub.f32 %v4381_v24, %v2060_v59  ;;  %v2087_v10 = vmul.f32 1.442695, %v2073_v12 }
 0xd88   :  { %v2236_v15 = vpop.permute.xlu1 %2235 }
 0xd89   :  { %v2085_v46 = vmul.f32 1.442695, %v2072_v8  ;;  %3624 = vpow2.f32 %v2087_v10  ;;  %v2241_v28 = vsel %vm777_vm2, %v2236_v15, 0 }
 0xd8b   :  { %v4404_v62 = vpop.eup %3620  ;;  %3626 = vpow2.f32 %v2085_v46 }
 0xd8c   :  { %v2103_v61 = vsel %vm286_vm1, %v4404_v62, 0.0  ;;  %v2284_v16 = vpop.permute.xlu1 %2283 }
 0xd8d   :  { %v4408_v5 = vpop.eup %3622  ;;  %2104 = vadd.xlane.f32.xlu1 %v2103_v61  ;;  %v2289_v45 = vsel %vm777_vm2, %v2284_v16, 0 }
 0xd8e   :  { %v2066_v63 = vpop.xlane.xlu0 %2065  ;;  %v2100_v1 = vsel %vm286_vm1, %v4408_v5, 0.0 }
 0xd8f   :  { %2101 = vadd.xlane.f32.xlu0 %v2100_v1  ;;  %v2074_v13 = vsub.f32 %v2038_v33, %v2066_v63 }
 0xd91   :  { %v2089_v19 = vmul.f32 1.442695, %v2074_v13 }
 0xd92   :  { %v2188_v2 = vpop.permute.xlu0 %2187 }
 0xd93   :  { %v2193_v3 = vsel %vm777_vm2, %v2188_v2, 0  ;;  %3628 = vpow2.f32 %v2089_v19  ;;  %v4420_v17 = vpop.eup %3624 }
 0xd94   :  { %3360 = vmatpush3.bf16.msra.mxu0 %v2193_v3 }
 0xd95   :  { %3371 = vmatprep.subr.bf16.mxu0 %v3830_v0 }
 0xd9e   :  { %2379 = vrot.lane.b32.xlu1 %v4301_v40, %s3825_s10  ;;  %v4422_v40 = vpop.eup %3626 }
 0xd9f   :  { %v2106_v27 = vsel %vm286_vm1, %v4422_v40, 0.0  ;;  %v4428_v18 = vpop.eup %3628 }
 0xda0   :  { %v2112_v23 = vsel %vm286_vm1, %v4428_v18, 0.0 }
 0xda5   :  { %2331 = vrot.lane.b32.xlu0 %v4303_v35, %s3825_s10  ;;  %v2109_v35 = vsel %vm286_vm1, %v4420_v17, 0.0 }
 0xdbd   :  { %v2093_v7 = vpop.xlane.xlu1 %2092 }
 0xdbe   :  { %3630 = vrcp.f32 %v2093_v7 }
 0xdc2   :  { %2110 = vadd.xlane.f32.xlu1 %v2109_v35 }
 0xdc3   :  { %v2096_v14 = vpop.xlane.xlu0 %2095 }
 0xdc4   :  { %3632 = vrcp.f32 %v2096_v14  ;;  %2107 = vadd.xlane.f32.xlu0 %v2106_v27 }
 0xdc8   :  { %v3631_v24 = vpop.eup %3630  ;;  %2113 = vadd.xlane.f32.xlu0 %v2112_v23 }
 0xdc9   :  { %v2123_v26 = vmul.f32 %v3631_v24, %v3615_v50  ;;  %v3552_v24 = vld [vmem:[#allocation8 + $0x10] sm:$0xff]  }
 0xdcb   :  { %v2131_v25 = vpack.c.bf16 %v2123_v26, %v2123_v26 }
 0xdcd   :  { %3356 = vmatmul.mubr.msk.bf16.vlgmr.msra.gmra.mrb[56].mxu1 %vm286_vm1, %v2131_v25 }
 0xdce   :  { %v3633_v43 = vpop.eup %3632  ;;  %3366 = vmatpush3.bf16.msra.mxu1 %v2241_v28  ;;  %3367 = vmatprep.mubr.msk.bf16.mxu1 %vm3831_vm0, %v3830_v0  ;;  %v3553_v28 = vld [vmem:[#allocation8 + $0x18] sm:$0xff]  }
 0xdcf   :  { %v2124_v21 = vmul.f32 %v3633_v43, %v4396_v41  ;;  %3377 = vmatprep.subr.bf16.mxu1 %v3830_v0 }
 0xdd1   :  { %v2132_v32 = vpack.c.bf16 %v2124_v21, %v2124_v21 }
 0xdd3   :  { %2475 = vrot.lane.b32.xlu1 %v4311_v20, %s3825_s10  ;;  %3362 = vmatmul.mubr.msk.bf16.vlgmr.msra.gmra.mrb[60].mxu0 %vm286_vm1, %v2132_v32 }
 0xdd4   :  { %3372 = vmatpush3.bf16.msra.mxu0 %v2289_v45  ;;  %3373 = vmatprep.mubr.msk.bf16.mxu0 %vm3831_vm0, %v3830_v0 }
 0xdd5   :  { %3383 = vmatprep.subr.bf16.mxu0 %v3830_v0 }
 0xdde   :  { %2427 = vrot.lane.b32.xlu0 %v4313_v22, %s3825_s10 }
 0xe14   :  { %v2099_v33 = vpop.xlane.xlu1 %2098 }
 0xe15   :  { %3634 = vrcp.f32 %v2099_v33 }
 0xe1a   :  { %v2105_v34 = vpop.xlane.xlu1 %2104 }
 0xe1b   :  { %3636 = vrcp.f32 %v2105_v34 }
 0xe1c   :  { %v2102_v36 = vpop.xlane.xlu0 %2101 }
 0xe1d   :  { %3638 = vrcp.f32 %v2102_v36 }
 0xe1e   :  { %v2380_v49 = vpop.permute.xlu1 %2379 }
 0xe1f   :  { %v3635_v37 = vpop.eup %3634  ;;  %v2385_v41 = vsel %vm777_vm2, %v2380_v49, 0 }
 0xe20   :  { %v2125_v20 = vmul.f32 %v3635_v37, %v4400_v57  ;;  %v2332_v44 = vpop.permute.xlu0 %2331 }
 0xe21   :  { %v2337_v39 = vsel %vm777_vm2, %v2332_v44, 0 }
 0xe22   :  { %v2133_v38 = vpack.c.bf16 %v2125_v20, %v2125_v20 }
 0xe24   :  { %3368 = vmatmul.mubr.msk.bf16.vlgmr.msra.gmra.mrb[60].mxu1 %vm286_vm1, %v2133_v38 }
 0xe25   :  { %v3637_v42 = vpop.eup %3636  ;;  %3378 = vmatpush3.bf16.msra.mxu1 %v2337_v39  ;;  %3379 = vmatprep.mubr.msk.bf16.mxu1 %vm3831_vm0, %v3830_v0 }
 0xe26   :  { %v2127_v22 = vmul.f32 %v3637_v42, %v4404_v62  ;;  %3389 = vmatprep.subr.bf16.mxu1 %v3830_v0 }
 0xe27   :  { %v3639_v47 = vpop.eup %3638 }
 0xe28   :  { %v2126_v60 = vmul.f32 %v3639_v47, %v4408_v5  ;;  %v2135_v53 = vpack.c.bf16 %v2127_v22, %v2127_v22 }
 0xe2a   :  { %v2134_v50 = vpack.c.bf16 %v2126_v60, %v2126_v60 }
 0xe2c   :  { %3374 = vmatmul.mubr.msk.bf16.vlgmr.msra.gmra.mrb[64].mxu0 %vm286_vm1, %v2134_v50  ;;  %3380 = vmatmul.mubr.msk.bf16.vlgmr.msra.gmra.mrb[64].mxu1 %vm286_vm1, %v2135_v53 }
 0xe2d   :  { %3384 = vmatpush3.bf16.msra.mxu0 %v2385_v41  ;;  %3391 = vmatprep.mubr.msk.bf16.mxu1 %vm3831_vm0, %v3830_v0 }
 0xe2e   :  { %3385 = vmatprep.mubr.msk.bf16.mxu0 %vm3831_vm0, %v3830_v0  ;;  %3395 = vmatprep.subr.bf16.mxu0 %v3830_v0 }
 0xe4f   :  { %v2111_v9 = vpop.xlane.xlu1 %2110 }
 0xe50   :  { %3640 = vrcp.f32 %v2111_v9 }
 0xe51   :  { %v2108_v11 = vpop.xlane.xlu0 %2107 }
 0xe52   :  { %3642 = vrcp.f32 %v2108_v11 }
 0xe53   :  { %v2476_v57 = vpop.permute.xlu1 %2475 }
 0xe54   :  { %v2481_v62 = vsel %vm777_vm2, %v2476_v57, 0 }
 0xe55   :  { %v2114_v54 = vpop.xlane.xlu0 %2113 }
 0xe56   :  { %3644 = vrcp.f32 %v2114_v54 }
 0xe59   :  { %v2428_v6 = vpop.permute.xlu0 %2427 }
 0xe5a   :  { %v3641_v52 = vpop.eup %3640  ;;  %v2433_v55 = vsel %vm777_vm2, %v2428_v6, 0 }
 0xe5b   :  { %v2129_v31 = vmul.f32 %v3641_v52, %v4420_v17  ;;  %3390 = vmatpush3.bf16.msra.mxu1 %v2433_v55 }
 0xe5c   :  { %v3643_v51 = vpop.eup %3642  ;;  %3401 = vmatprep.subr.bf16.mxu1 %v3830_v0 }
 0xe5d   :  { %v2128_v56 = vmul.f32 %v3643_v51, %v4422_v40  ;;  %v2137_v48 = vpack.c.bf16 %v2129_v31, %v2129_v31 }
 0xe5f   :  { %3392 = vmatmul.mubr.msk.bf16.vlgmr.msra.gmra.mrb[68].mxu1 %vm286_vm1, %v2137_v48  ;;  %v2136_v58 = vpack.c.bf16 %v2128_v56, %v2128_v56  ;;  %v3554_v56 = vld [vmem:[#allocation10 + $0x40] sm:$0xff]   ;;  %v3555_v48 = vld [vmem:[#allocation10 + $0x48] sm:$0xff]  }
 0xe60   :  { %v3645_v59 = vpop.eup %3644  ;;  %3405 = vmatprep.mubr.msk.bf16.mxu1 %vm3831_vm0, %v3830_v0  ;;  %3402 = vmatpush3.bf16.msra.mxu1 %v3552_v24  ;;  %v2979_v24 = vld [vmem:[%s4545_s3 + $0x1] ss:$0 sm:$0xff] }
 0xe61   :  { %3386 = vmatmul.mubr.msk.bf16.vlgmr.msra.gmra.mrb[68].mxu0 %vm286_vm1, %v2136_v58  ;;  %v2130_v61 = vmul.f32 %v3645_v59, %v4428_v18  ;;  %3403 = vmatprep.subr.bf16.mxu1 %v3830_v0 }
 0xe62   :  { %3396 = vmatpush3.bf16.msra.mxu0 %v2481_v62  ;;  %3397 = vmatprep.mubr.msk.bf16.mxu0 %vm3831_vm0, %v3830_v0 }
 0xe63   :  { %3409 = vmatprep.subr.bf16.mxu0 %v3830_v0  ;;  %v2138_v5 = vpack.c.bf16 %v2130_v61, %v2130_v61 }
 0xe64   :  { %3404 = vmatpush3.bf16.msra.mxu1 %v3553_v28 }
 0xe65   :  { %3429 = vmatprep.subr.bf16.mxu1 %v3830_v0 }
 0xe69   :  { %3398 = vmatmul.mubr.msk.bf16.vlgmr.msra.gmra.mrb[72].mxu0 %vm286_vm1, %v2138_v5 }
 0xe6a   :  { %3425 = vmatprep.mubr.msk.bf16.mxu0 %vm3831_vm0, %v3830_v0  ;;  %3410 = vmatpush3.bf16.msra.mxu0 %v3554_v56 }
 0xe6b   :  { %3411 = vmatprep.subr.bf16.mxu0 %v3830_v0 }
 0xe6e   :  { %3412 = vmatpush3.bf16.msra.mxu0 %v3555_v48 }
 0xe6f   :  { %3413 = vmatprep.subr.bf16.mxu0 %v3830_v0 }
 0xea0   :  { %v2181_v63 = vpop.f32.mrb[56].mxu1 }
 0xea1   :  { %v3357_v1 = vpop.f32.mrb[57].mxu1 }
 0xea2   :  { %v2184_v2 = vpop.f32.mrb[58].mxu1 }
 0xea3   :  { %v3358_v3 = vpop.f32.mrb[59].mxu1  ;;  %v3556_v2 = vld [vmem:[#allocation10 + $0x50] sm:$0xff]  }
 0xea4   :  { %3414 = vmatpush3.bf16.msra.mxu0 %v3556_v2  ;;  %v3558_v3 = vld [vmem:[#allocation10 + $0x60] sm:$0xff]  }
 0xea5   :  { %3415 = vmatprep.subr.bf16.mxu0 %v3830_v0 }
 0xea6   :  { %v2229_v4 = vpop.f32.mrb[60].mxu0 }
 0xea7   :  { %v3363_v12 = vpop.f32.mrb[61].mxu0 }
 0xea8   :  { %v2232_v8 = vpop.f32.mrb[62].mxu0  ;;  %v3561_v12 = vld [vmem:[#allocation10 + $0x78] sm:$0xff]  }
 0xea9   :  { %v3364_v10 = vpop.f32.mrb[63].mxu0  ;;  %v3562_v8 = vld [vmem:[#allocation11 + $0x40] sm:$0xff]  }
 0xeaa   :  { %v3563_v10 = vld [vmem:[#allocation11 + $0x48] sm:$0xff]  }
 0xef7   :  { %v2277_v46 = vpop.f32.mrb[60].mxu1 }
 0xef8   :  { %v3369_v13 = vpop.f32.mrb[61].mxu1 }
 0xef9   :  { %v2280_v15 = vpop.f32.mrb[62].mxu1  ;;  %v3565_v13 = vld [vmem:[#allocation11 + $0x58] sm:$0xff]  }
 0xefa   :  { %v3370_v19 = vpop.f32.mrb[63].mxu1  ;;  %v3566_v15 = vld [vmem:[#allocation11 + $0x60] sm:$0xff]  }
 0xefb   :  { %v3567_v19 = vld [vmem:[#allocation11 + $0x68] sm:$0xff]  }
 0xeff   :  { %v2325_v16 = vpop.f32.mrb[64].mxu0  ;;  %v2373_v7 = vpop.f32.mrb[64].mxu1 }
 0xf00   :  { %v3503_v17 = vpack.i.bf16 %v2325_v16, %v2277_v46  ;;  %v3375_v40 = vpop.f32.mrb[65].mxu0  ;;  %v3381_v35 = vpop.f32.mrb[65].mxu1  ;;  %v3564_v46 = vld [vmem:[#allocation11 + $0x50] sm:$0xff]  }
 0xf01   :  { %v2328_v14 = vpop.f32.mrb[66].mxu0  ;;  %v2376_v27 = vpop.f32.mrb[66].mxu1 }
 0xf02   :  { %v3382_v18 = vpop.f32.mrb[67].mxu1  ;;  %3504 = vrot.lane.b32.xlu0 %v3503_v17, %s3822_s20  ;;  %v3376_v23 = vpop.f32.mrb[67].mxu0 }
 0xf32   :  { %v2469_v26 = vpop.f32.mrb[68].mxu1 }
 0xf33   :  { %v3393_v25 = vpop.f32.mrb[69].mxu1 }
 0xf34   :  { %v2421_v43 = vpop.f32.mrb[68].mxu0  ;;  %v2472_v21 = vpop.f32.mrb[70].mxu1 }
 0xf35   :  { %v3508_v32 = vpack.i.bf16 %v2421_v43, %v2373_v7  ;;  %v3387_v45 = vpop.f32.mrb[69].mxu0  ;;  %v3394_v33 = vpop.f32.mrb[71].mxu1  ;;  %v3568_v21 = vld [vmem:[#allocation11 + $0x70] sm:$0xff]  }
 0xf36   :  { %v2424_v34 = vpop.f32.mrb[70].mxu0 }
 0xf37   :  { %3509 = vrot.lane.b32.xlu1 %v3508_v32, %s3836_s6  ;;  %v3388_v36 = vpop.f32.mrb[71].mxu0  ;;  %v3569_v32 = vld [vmem:[#allocation11 + $0x78] sm:$0xff]  }
 0xf3c   :  { %v2517_v37 = vpop.f32.mrb[72].mxu0 }
 0xf3d   :  { %v3513_v20 = vpack.i.bf16 %v2517_v37, %v2469_v26  ;;  %v3399_v44 = vpop.f32.mrb[73].mxu0 }
 0xf3e   :  { %v2520_v38 = vpop.f32.mrb[74].mxu0 }
 0xf3f   :  { %3514 = vrot.lane.b32.xlu0 %v3513_v20, %s3837_s24  ;;  %v3400_v39 = vpop.f32.mrb[75].mxu0 }
 0xf74   :  { %v3505_v42 = vpop.permute.xlu0 %3504 }
 0xf75   :  { %v3507_v47 = vunpack.i.h.bf16 %v3505_v42  ;;  %v3506_v60 = vunpack.i.l.bf16 %v3505_v42 }
 0xf77   :  { %v2548_v41 = vsel %vm286_vm1, %v2229_v4, %v3507_v47  ;;  %v2547_v9 = vsel %vm286_vm1, %v2181_v63, %v3506_v60  ;;  %v3560_v4 = vld [vmem:[#allocation10 + $0x70] sm:$0xff]  }
 0xfa9   :  { %v3510_v22 = vpop.permute.xlu1 %3509 }
 0xfaa   :  { %v3512_v49 = vunpack.i.h.bf16 %v3510_v22  ;;  %v3511_v50 = vunpack.i.l.bf16 %v3510_v22 }
 0xfac   :  { %v2550_v6 = vsel %vm1183_vm3, %v2548_v41, %v3512_v49  ;;  %v2549_v52 = vsel %vm1183_vm3, %v2547_v9, %v3511_v50 }
 0xfb1   :  { %v3515_v53 = vpop.permute.xlu0 %3514 }
 0xfb2   :  { %v3517_v11 = vunpack.i.h.bf16 %v3515_v53  ;;  %v3516_v54 = vunpack.i.l.bf16 %v3515_v53 }
 0xfb4   :  { %v2552_v55 = vsel %vm1186_vm4, %v2550_v6, %v3517_v11  ;;  %v2551_v31 = vsel %vm1186_vm4, %v2549_v52, %v3516_v54  ;;  %v2996_v52 = vld [vmem:[%s4546_s4] ss:$0 sm:$0xff] }
 0xfb5   :  { %v2553_v51 = vpack.c.bf16 %v2552_v55, %v2551_v31 }
 0xfb7   :  { %3406 = vmatmul.mubr.msk.bf16.vlgmr.msra.gmra.mrb[72].mxu1 %vm1206_vm5, %v2553_v51 }
 0xfb8   :  { %3445 = vmatprep.mubr.msk.bf16.mxu1 %vm3831_vm0, %v3830_v0  ;;  %3430 = vmatpush3.bf16.msra.mxu1 %v3562_v8 }
 0xfb9   :  { %3431 = vmatprep.subr.bf16.mxu1 %v3830_v0 }
 0xfbc   :  { %3432 = vmatpush3.bf16.msra.mxu1 %v3563_v10 }
 0xfbd   :  { %3433 = vmatprep.subr.bf16.mxu1 %v3830_v0 }
 0xfc0   :  { %3434 = vmatpush3.bf16.msra.mxu1 %v3564_v46 }
 0xfc1   :  { %3435 = vmatprep.subr.bf16.mxu1 %v3830_v0 }
 0xfc4   :  { %3436 = vmatpush3.bf16.msra.mxu1 %v3565_v13 }
 0xfc5   :  { %3437 = vmatprep.subr.bf16.mxu1 %v3830_v0 }
 0xfc8   :  { %3438 = vmatpush3.bf16.msra.mxu1 %v3566_v15 }
 0xfc9   :  { %3439 = vmatprep.subr.bf16.mxu1 %v3830_v0 }
 0xfcc   :  { %3440 = vmatpush3.bf16.msra.mxu1 %v3567_v19 }
 0xfcd   :  { %3441 = vmatprep.subr.bf16.mxu1 %v3830_v0 }
 0xfd0   :  { %3442 = vmatpush3.bf16.msra.mxu1 %v3568_v21 }
 0xfd1   :  { %3443 = vmatprep.subr.bf16.mxu1 %v3830_v0 }
 0xfd4   :  { %3444 = vmatpush3.bf16.msra.mxu1 %v3569_v32 }
0x108a   :  { %v2608_v57 = vpop.f32.mrb[72].mxu1 }
0x108b   :  { %v4496_v58 = vadd.f32 %v2608_v57, %v4262_v29  ;;  %v3407_v59 = vpop.f32.mrb[73].mxu1  ;;  %v3557_v29 = vld [vmem:[#allocation10 + $0x58] sm:$0xff]  }
0x108c   :  { %v2611_v62 = vpop.f32.mrb[74].mxu1  ;;  %3416 = vmatpush3.bf16.msra.mxu0 %v3557_v29 }
0x108d   :  { %v4499_v61 = vadd.f32 %v2611_v62, %v4265_v30  ;;  %v3408_v5 = vpop.f32.mrb[75].mxu1  ;;  %v2619_v63 = vmul.f32 %v4496_v58, %v4496_v58  ;;  %3417 = vmatprep.subr.bf16.mxu0 %v3830_v0  ;;  %v3559_v30 = vld [vmem:[#allocation10 + $0x68] sm:$0xff]  }
0x108f   :  { %2621 = vadd.xlane.f32.xlu1 %v2619_v63  ;;  %v2620_v1 = vmul.f32 %v4499_v61, %v4499_v61 }
0x1090   :  { %3418 = vmatpush3.bf16.msra.mxu0 %v3558_v3 }
0x1091   :  { %2623 = vadd.xlane.f32.xlu0 %v2620_v1  ;;  %3419 = vmatprep.subr.bf16.mxu0 %v3830_v0 }
0x1094   :  { %3420 = vmatpush3.bf16.msra.mxu0 %v3559_v30 }
0x1095   :  { %3421 = vmatprep.subr.bf16.mxu0 %v3830_v0 }
0x1098   :  { %3422 = vmatpush3.bf16.msra.mxu0 %v3560_v4 }
0x1099   :  { %3423 = vmatprep.subr.bf16.mxu0 %v3830_v0 }
0x109c   :  { %3424 = vmatpush3.bf16.msra.mxu0 %v3561_v12 }
0x111c   :  { %v2622_v16 = vpop.xlane.xlu1 %2621 }
0x111d   :  { %v2625_v7 = vmul.f32 0.03125, %v2622_v16 }
0x111e   :  { %v2624_v17 = vpop.xlane.xlu0 %2623 }
0x111f   :  { %v2627_v40 = vadd.f32 1e-06, %v2625_v7  ;;  %v2626_v35 = vmul.f32 0.03125, %v2624_v17 }
0x1121   :  { %3646 = vrsqrt.f32 %v2627_v40  ;;  %v2628_v14 = vadd.f32 1e-06, %v2626_v35 }
0x1123   :  { %3648 = vrsqrt.f32 %v2628_v14 }
0x112b   :  { %v3647_v27 = vpop.eup %3646 }
0x112c   :  { %v2631_v18 = vmul.f32 %v3647_v27, %v4496_v58 }
0x112d   :  { %v3649_v23 = vpop.eup %3648 }
0x112e   :  { %v2632_v26 = vmul.f32 %v3649_v23, %v4499_v61  ;;  %v2639_v25 = vmul.f32 %v2979_v24, %v2631_v18 }
0x1130   :  { %v2640_v28 = vmul.f32 %v2979_v24, %v2632_v26 }
0x1132   :  { %v2641_v43 = vpack.c.bf16 %v2640_v28, %v2639_v25 }
0x1134   :  { %3426 = vmatmul.mubr.bf16.vlgmr.msra.gmra.mrb[76].mxu0 %v2641_v43 }
0x1207   :  { %v2741_v45 = vpop.f32.mrb[76].mxu0 }
0x1208   :  { %v3427_v33 = vpop.f32.mrb[77].mxu0  ;;  %v2748_v36 = vmax.f32 %v2741_v45, 0.0 }
0x1209   :  { %v2744_v34 = vpop.f32.mrb[78].mxu0 }
0x120a   :  { %v2749_v37 = vmax.f32 %v2744_v34, 0.0  ;;  %v3428_v20 = vpop.f32.mrb[79].mxu0 }
0x120c   :  { %v2750_v44 = vpack.c.bf16 %v2749_v37, %v2748_v36 }
0x120e   :  { %3446 = vmatmul.mubr.bf16.vlgmr.msra.gmra.mrb[76].mxu1 %v2750_v44 }
0x12e1   :  { %v2850_v38 = vpop.f32.mrb[76].mxu1 }
0x12e2   :  { %v2857_v39 = vadd.f32 %v2850_v38, %v4496_v58  ;;  %v3447_v42 = vpop.f32.mrb[77].mxu1 }
0x12e3   :  { %v2853_v22 = vpop.f32.mrb[78].mxu1 }
0x12e4   :  { %v2858_v47 = vadd.f32 %v2853_v22, %v4499_v61  ;;  %v3448_v60 = vpop.f32.mrb[79].mxu1  ;;  %v2860_v49 = vmul.f32 %v2857_v39, %v2857_v39 }
0x12e6   :  { %2862 = vadd.xlane.f32.xlu0 %v2860_v49  ;;  %v2861_v0 = vmul.f32 %v2858_v47, %v2858_v47 }
0x12e8   :  { %2864 = vadd.xlane.f32.xlu1 %v2861_v0 }
0x1373   :  { %v2863_v50 = vpop.xlane.xlu0 %2862 }
0x1374   :  { %v2866_v53 = vmul.f32 0.03125, %v2863_v50 }
0x1375   :  { %v2865_v41 = vpop.xlane.xlu1 %2864 }
0x1376   :  { %v2868_v9 = vadd.f32 1e-06, %v2866_v53  ;;  %v2867_v11 = vmul.f32 0.03125, %v2865_v41 }
0x1378   :  { %3650 = vrsqrt.f32 %v2868_v9  ;;  %v2869_v54 = vadd.f32 1e-06, %v2867_v11 }
0x137a   :  { %3652 = vrsqrt.f32 %v2869_v54 }
0x1382   :  { %v3651_v6 = vpop.eup %3650 }
0x1383   :  { %v2872_v55 = vmul.f32 %v3651_v6, %v2857_v39 }
0x1384   :  { %v3653_v31 = vpop.eup %3652 }
0x1385   :  { %v2873_v51 = vmul.f32 %v3653_v31, %v2858_v47  ;;  %v2880_v56 = vmul.f32 %v2996_v52, %v2872_v55 }
0x1387   :  { %v2881_v48 = vmul.f32 %v2996_v52, %v2873_v51  ;;  %2882 = vst [vmem:[#allocation13] sm:$0xff] %v2880_v56 }
0x1389   :  { %2883 = vst [vmem:[#allocation13 + $0x8] sm:$0xff] %v2881_v48 }
0x138a   :  { %3799 = shalt.err (!%p3796_p10)
}
0x138b   :  { %s3800_s4 = scalar_lea.hbm %s4551_s9, 256 }
0x138c   :  { %p3801_p11 = scmp.ne.s32.totalorder %s4551_s9, %s3800_s4  ;;  %p3804_p12 = scmp.lt.u32.totalorder %s3800_s4, %s4551_s9 }
0x138e   :  { %p3806_p13 = pnand %p3804_p12, %p3801_p11 }
0x1390   :  { %3809 = shalt.err (!%p3806_p13)
}
0x1391   :  { %2895 = dma.vmem_to_hbm [thread:$0]  %s2890_s15, 256, %s4551_s9, [#allocation4], %s3821_s19, %s3821_s19, %s3822_s20  }
0x1392   :  { %3818 = dma.done.wait [#allocation4], 256  }
0x1393   :  { %3819 = vsyncadd [#allocation4], 4294967040 }
0x1394   :  { %2899 = vsyncpa [#allocation3], 1 }
0x1395   :  { %2900 = vsyncpa [#allocation6], 1 }
0x1396   :  { %2901 = vsyncpa [#allocation9], 1 }
0x1397   :  { %2902 = vsyncpa [#allocation12], 1 }
0x1398   :  { %2903 = vsyncpa [#allocation4], 1 }

</bundles_post_ra>
